<compile_context>
chip_gen: v6e
topology: v6e:2x2x1
jax: 0.10.0
libtpu: 0.0.40
codegen_flags: <defaults>
</compile_context>

<pallas_src>
import jax
import jax.numpy as jnp
from jax.experimental import pallas as pl
from jax.experimental.pallas import tpu as pltpu


def _make_mlp_soc_kernel(n_hidden, compute_dtype):
    """Fused kernel: n_hidden Linear+ReLU layers (biases folded into the weights via
    a propagated ones lane), then a single fused (output + projection + bias) dot.

    Kernel ref layout:
      refs[0]              : x block                  (block_b, D)          bf16
      refs[1 : 1+n_hidden] : augmented hidden weights (d_in+1, d_out+1)     bf16
                             [[W_i, 0], [b_i, 1]]
      refs[1+n_hidden]     : fused tail weight        (d_last + 1 + D, 1)   bf16
                             rows [0:d_last]   = W_out
                             row  d_last       = b_out + b_proj  (hits the ones lane)
                             rows [d_last+1:]  = W_proj
      refs[-1]             : output block             (block_b, 1)          f32
    """

    def kernel(*refs):
        x_ref = refs[0]
        w_refs = refs[1:1 + n_hidden]
        w_tail_ref = refs[1 + n_hidden]
        out_ref = refs[-1]

        x = x_ref[...]                                         # (block_b, D) bf16
        ones = jnp.ones((x.shape[0], 1), dtype=compute_dtype)
        h = jnp.concatenate([x, ones], axis=1)                 # (block_b, D+1)

        for li in range(n_hidden):
            # Bias lives in the last contraction row of the augmented weight; the
            # last output column keeps the ones lane alive (relu(1) = 1).
            acc = jnp.dot(h, w_refs[li][...], preferred_element_type=jnp.float32)
            h = jnp.maximum(acc, 0.0).astype(compute_dtype)    # (block_b, d_out+1)
            # Dropout is identity at inference time (eval mode: no mask, no scale).

        # Fused output + residual: [h_last | ones | x] @ [W_out ; b_out+b_proj ; W_proj].
        tail_in = jnp.concatenate([h, x], axis=1)              # (block_b, d_last+1+D)
        out = jnp.dot(tail_in, w_tail_ref[...], preferred_element_type=jnp.float32)
        out_ref[...] = out.astype(out_ref.dtype)

    return kernel


def _num_tensorcores():
    """Best-effort count of TensorCores per device (v7x / megacore -> 2)."""
    try:
        dev = jax.devices()[0]
        return max(int(getattr(dev, "num_cores", 1) or 1), 1)
    except Exception:
        return 1


def _choose_block_b(B, target=8192, num_cores=1):
    """Largest multiple-of-16 divisor of B that is <= target; on multi-core chips,
    prefer a grid length that is a positive multiple of num_cores (even TC split)."""
    if B < 16 or B % 16 != 0:
        return B
    cap = (min(target, B) // 16) * 16
    constraint_passes = []
    if num_cores > 1:
        constraint_passes.append(lambda g: g >= num_cores and g % num_cores == 0)
    constraint_passes.append(lambda g: True)
    for ok in constraint_passes:
        for cand in range(cap, 15, -16):
            if B % cand == 0 and ok(B // cand):
                return cand
    return B


def mlp_soc_forward(x, hidden_params, out_params, proj_params, *,
                    block_b=None, param_dtype=jnp.bfloat16):
    """x: (B, input_dim) float32.
    hidden_params: list of (W (in,out), b (1,out)).
    out_params: (W_out (d_last,1), b_out (1,1)).
    proj_params: (W_proj (input_dim,1), b_proj (1,1))."""
    B, D = x.shape
    if block_b is None:
        block_b = _choose_block_b(B, num_cores=_num_tensorcores())
    assert B % block_b == 0, "block_b must divide B"

    n_hidden = len(hidden_params)

    # Augmented hidden weights: [[W, 0], [b, 1]] so a constant-1 lane carries the
    # bias through every layer (relu(1) = 1 keeps it alive).
    aug_weights = []
    d_in = D
    for w, b in hidden_params:
        d_out = w.shape[1]
        wa = jnp.zeros((d_in + 1, d_out + 1), jnp.float32)
        wa = wa.at[:d_in, :d_out].set(w.astype(jnp.float32))
        wa = wa.at[d_in, :d_out].set(b.reshape(-1).astype(jnp.float32))
        wa = wa.at[d_in, d_out].set(1.0)
        aug_weights.append(wa.astype(param_dtype))
        d_in = d_out
    d_last = d_in

    # Fused tail weight: [W_out ; (b_out + b_proj) ; W_proj]  -> (d_last + 1 + D, 1).
    w_tail = jnp.concatenate(
        [out_params[0].astype(jnp.float32),
         (out_params[1] + proj_params[1]).reshape(1, 1).astype(jnp.float32),
         proj_params[0].astype(jnp.float32)],
        axis=0,
    ).astype(param_dtype)

    kernel = _make_mlp_soc_kernel(n_hidden, param_dtype)
    x_in = x.astype(param_dtype)

    # Batch tiled along the grid; all parameters broadcast (constant block index).
    in_specs = [pl.BlockSpec((block_b, D), lambda i: (i, 0))]
    for w in aug_weights:
        in_specs.append(pl.BlockSpec(w.shape, lambda i: (0, 0)))
    in_specs.append(pl.BlockSpec(w_tail.shape, lambda i: (0, 0)))
    out_specs = pl.BlockSpec((block_b, 1), lambda i: (i, 0))

    return pl.pallas_call(
        kernel,
        out_shape=jax.ShapeDtypeStruct((B, 1), jnp.float32),
        grid_spec=pltpu.PrefetchScalarGridSpec(
            num_scalar_prefetch=0,
            grid=(B // block_b,),
            in_specs=in_specs,
            out_specs=out_specs,
        ),
        compiler_params=pltpu.CompilerParams(
            dimension_semantics=("parallel",),          # megacore-shard the batch axis
            vmem_limit_bytes=48 * 1024 * 1024,          # safe on v5e/v6e/v7x for big tiles
        ),
    )(x_in, *aug_weights, w_tail)


def init_linear(key, fan_in, fan_out):
    """Deterministic init mimicking torch.nn.Linear (uniform +-1/sqrt(fan_in)).
    Returns W with shape (fan_in, fan_out) and b with shape (1, fan_out)."""
    k_w, k_b = jax.random.split(key)
    bound = 1.0 / jnp.sqrt(jnp.float32(fan_in))
    w = jax.random.uniform(k_w, (fan_in, fan_out), jnp.float32, -bound, bound)
    b = jax.random.uniform(k_b, (1, fan_out), jnp.float32, -bound, bound)
    return w, b


def reference_forward(x, hidden_params, out_params, proj_params):
    """Pure-JAX f32 reference of MLP_soc.forward (inference mode)."""
    identity = x
    h = x
    for w, b in hidden_params:
        h = jnp.maximum(h @ w + b, 0.0)
    out = h @ out_params[0] + out_params[1]
    res = identity @ proj_params[0] + proj_params[1]
    return out + res


if __name__ == "__main__":
    # Shapes consistent with the module: input_dim=32, embed_dims=[64, 32].
    # Batch kept small; the block_b chooser still exercises the tiled grid path
    # (and an even grid split on multi-core parts).
    B = 1024
    input_dim = 32
    embed_dims = [64, 32]
    dropout = 0.1  # inference: dropout is identity
    # TODO(synk): training-mode Dropout (mask + 1/(1-p) scaling) is not implemented.

    key = jax.random.PRNGKey(0)
    keys = jax.random.split(key, len(embed_dims) + 3)

    hidden_params = []
    d_in = input_dim
    for i, d_out in enumerate(embed_dims):
        hidden_params.append(init_linear(keys[i], d_in, d_out))
        d_in = d_out

    out_params = init_linear(keys[len(embed_dims)], d_in, 1)            # Linear(d_last, 1)
    proj_params = init_linear(keys[len(embed_dims) + 1], input_dim, 1)  # Linear(D, 1)

    x = jax.random.normal(keys[-1], (B, input_dim), jnp.float32)

    y = mlp_soc_forward(x, hidden_params, out_params, proj_params)
    y = jax.block_until_ready(y)

    y_ref = reference_forward(x, hidden_params, out_params, proj_params)
    assert y.shape == (B, 1)
    # bf16 inputs/weights/biases (f32 accumulation) -> loose but deterministic tolerance.
    assert jnp.allclose(y, y_ref, atol=8e-2, rtol=8e-2), (
        "mismatch vs JAX reference; max abs err = %f" % float(jnp.max(jnp.abs(y - y_ref)))
    )

    print("KERNEL_OK")
</pallas_src>

<mosaic_0001>
module attributes {stable_mosaic.version = 11 : i64} {
  func.func @kernel(%arg0: i32, %arg1: memref<1024x32xbf16, #tpu.memory_space<vmem>>, %arg2: memref<33x65xbf16, #tpu.memory_space<vmem>>, %arg3: memref<65x33xbf16, #tpu.memory_space<vmem>>, %arg4: memref<65x1xbf16, #tpu.memory_space<vmem>>, %arg5: memref<1024x1xf32, #tpu.memory_space<vmem>>) attributes {dimension_semantics = [#tpu.dimension_semantics<parallel>], iteration_bounds = array<i64: 1>, scalar_prefetch = 0 : i64, scratch_operands = 0 : i64, tpu.core_type = #tpu.core_type<tc>, window_params = [{transform_indices = @transform_0, window_bounds = array<i64: 1024, 32>}, {pipeline_mode = #tpu.pipeline_mode<synchronous>, transform_indices = @transform_1, window_bounds = array<i64: 33, 65>}, {pipeline_mode = #tpu.pipeline_mode<synchronous>, transform_indices = @transform_2, window_bounds = array<i64: 65, 33>}, {pipeline_mode = #tpu.pipeline_mode<synchronous>, transform_indices = @transform_3, window_bounds = array<i64: 65, 1>}, {transform_indices = @transform_4, window_bounds = array<i64: 1024, 1>}]} {
    %c0 = arith.constant 0 : index
    %c0_0 = arith.constant 0 : index
    %0 = vector.load %arg1[%c0, %c0_0] : memref<1024x32xbf16, #tpu.memory_space<vmem>>, vector<1024x32xbf16>
    %cst = arith.constant 1.000000e+00 : bf16
    %1 = vector.broadcast %cst : bf16 to vector<1024x1xbf16>
    %2 = tpu.concatenate %0, %1 in 1 : vector<1024x32xbf16>, vector<1024x1xbf16> -> vector<1024x33xbf16>
    %c0_1 = arith.constant 0 : index
    %c0_2 = arith.constant 0 : index
    %3 = vector.load %arg2[%c0_1, %c0_2] : memref<33x65xbf16, #tpu.memory_space<vmem>>, vector<33x65xbf16>
    %cst_3 = arith.constant dense<0.000000e+00> : vector<1024x65xf32>
    %4 = tpu.matmul %2, %3, %cst_3 {dimension_numbers = #tpu.dot_dimension_numbers<[1], [0], [0], [1], [0, 0, 1, 1], [], []>} : vector<1024x33xbf16>, vector<33x65xbf16>, vector<1024x65xf32> -> vector<1024x65xf32>
    %cst_4 = arith.constant 0.000000e+00 : f32
    %5 = vector.broadcast %cst_4 : f32 to vector<1024x65xf32>
    %6 = arith.maximumf %4, %5 : vector<1024x65xf32>
    %7 = arith.truncf %6 : vector<1024x65xf32> to vector<1024x65xbf16>
    %c0_5 = arith.constant 0 : index
    %c0_6 = arith.constant 0 : index
    %8 = vector.load %arg3[%c0_5, %c0_6] : memref<65x33xbf16, #tpu.memory_space<vmem>>, vector<65x33xbf16>
    %cst_7 = arith.constant dense<0.000000e+00> : vector<1024x33xf32>
    %9 = tpu.matmul %7, %8, %cst_7 {dimension_numbers = #tpu.dot_dimension_numbers<[1], [0], [0], [1], [0, 0, 1, 1], [], []>} : vector<1024x65xbf16>, vector<65x33xbf16>, vector<1024x33xf32> -> vector<1024x33xf32>
    %cst_8 = arith.constant 0.000000e+00 : f32
    %10 = vector.broadcast %cst_8 : f32 to vector<1024x33xf32>
    %11 = arith.maximumf %9, %10 : vector<1024x33xf32>
    %12 = arith.truncf %11 : vector<1024x33xf32> to vector<1024x33xbf16>
    %13 = tpu.concatenate %12, %0 in 1 : vector<1024x33xbf16>, vector<1024x32xbf16> -> vector<1024x65xbf16>
    %c0_9 = arith.constant 0 : index
    %c0_10 = arith.constant 0 : index
    %14 = vector.load %arg4[%c0_9, %c0_10] : memref<65x1xbf16, #tpu.memory_space<vmem>>, vector<65x1xbf16>
    %cst_11 = arith.constant dense<0.000000e+00> : vector<1024x1xf32>
    %15 = tpu.matmul %13, %14, %cst_11 {dimension_numbers = #tpu.dot_dimension_numbers<[1], [0], [0], [1], [0, 0, 1, 1], [], []>} : vector<1024x65xbf16>, vector<65x1xbf16>, vector<1024x1xf32> -> vector<1024x1xf32>
    %c0_12 = arith.constant 0 : index
    %c0_13 = arith.constant 0 : index
    %16 = vector.load %arg5[%c0_12, %c0_13] : memref<1024x1xf32, #tpu.memory_space<vmem>>, vector<1024x1xf32>
    tpu.vector_store %arg5[%c0_12, %c0_13], %15 {strides = array<i32>} : memref<1024x1xf32, #tpu.memory_space<vmem>>, vector<1024x1xf32>,
    return
  }
  func.func @transform_0(%arg0: i32) -> (i32, i32) {
    %c0_i32 = arith.constant 0 : i32
    %c0_i32_0 = arith.constant 0 : i32
    return %arg0, %c0_i32 : i32, i32
  }
  func.func @transform_1(%arg0: i32) -> (i32, i32) {
    %c0_i32 = arith.constant 0 : i32
    %c0_i32_0 = arith.constant 0 : i32
    %c0_i32_1 = arith.constant 0 : i32
    return %c0_i32, %c0_i32_0 : i32, i32
  }
  func.func @transform_2(%arg0: i32) -> (i32, i32) {
    %c0_i32 = arith.constant 0 : i32
    %c0_i32_0 = arith.constant 0 : i32
    %c0_i32_1 = arith.constant 0 : i32
    return %c0_i32, %c0_i32_0 : i32, i32
  }
  func.func @transform_3(%arg0: i32) -> (i32, i32) {
    %c0_i32 = arith.constant 0 : i32
    %c0_i32_0 = arith.constant 0 : i32
    %c0_i32_1 = arith.constant 0 : i32
    return %c0_i32, %c0_i32_0 : i32, i32
  }
  func.func @transform_4(%arg0: i32) -> (i32, i32) {
    %c0_i32 = arith.constant 0 : i32
    %c0_i32_0 = arith.constant 0 : i32
    return %arg0, %c0_i32 : i32, i32
  }
}

</mosaic_0001>

<bundles_post_ra>
// kernel: tpu_custom_call.1
= control target key start
LH: loop header
LB: loop body
LE: loop exit
PB: predicated region body
PF: predicated region fallthrough
CT: control target
= control target key end

     0   :  { %vm746_vm0 = vcmask 1040384   ;;  %v4592_v1 = vmov 0   ;;  %vm467_vm1 = vcmask 261120   ;;  %vm617_vm2 = vcmask 269312   ;;  %s4593_s24 = smov 33   ;;  %s6199_s1 = inlined_call_operand.vmem [shape: bf16[33,65], index: 1, kind: input, shape index: {}]   ;;  %s6200_s0 = inlined_call_operand.vmem [shape: bf16[1024,32], index: 0, kind: input, shape index: {}]   ;;  %s6201_s2 = inlined_call_operand.vmem [shape: bf16[65,33], index: 2, kind: input, shape index: {}]   ;;  %s6202_s3 = inlined_call_operand.vmem [shape: bf16[65,1], index: 3, kind: input, shape index: {}]   ;;  %s6203_s4 = inlined_call_operand.vmem [shape: f32[1024,1], index: 4, kind: output, shape index: {}]  }
   0x1   :  { %v4515_v0 = vld [vmem:[%s6199_s1 + $0x10] ss:$0 sps:$4 sm:$0x11]   ;;  %v4622_v2 = vsel %vm746_vm0, 65535, %v4592_v1  ;;  %v4516_v4 = vld [vmem:[%s6199_s1 + $0x8] sm:$0xff]   ;;  %v4631_v5 = vld [vmem:[%s6200_s0] sm:$0xff]  }
   0x2   :  { %v750_v3 = vand.u32 %v4515_v0, %v4622_v2  ;;  %v470_v6 = vsel %vm467_vm1, %v4631_v5, 1065369472  ;;  %v4517_v7 = vld [vmem:[%s6199_s1] sm:$0xff]   ;;  %v4642_v8 = vld [vmem:[%s6200_s0 + $0x8] sm:$0xff]   ;;  %v4647_v9 = vld [vmem:[%s6200_s0 + $0x10] sm:$0xff]   ;;  %2458 = vrot.lane.b32.xlu0 %v4631_v5, %s4593_s24  ;;  %vm1525_vm3 = vcmask 531456  }
   0x3   :  { %4103 = vmatprep.mubr.msk.bf16.mxu0 %vm617_vm2, %v470_v6  ;;  %v472_v10 = vsel %vm467_vm1, %v4642_v8, 1065369472  ;;  %v474_v11 = vsel %vm467_vm1, %v4647_v9, 1065369472  ;;  %v4658_v12 = vld [vmem:[%s6200_s0 + $0x18] sm:$0xff]   ;;  %v4663_v13 = vld [vmem:[%s6200_s0 + $0x20] sm:$0xff]   ;;  %2462 = vrot.lane.b32.xlu1 %v4647_v9, %s4593_s24 }
   0x4   :  { %4097 = vmatprep.subr.bf16.mxu0 %v750_v3  ;;  %4507 = vmatprep.subr.bf16.mxu1 %v750_v3  ;;  %v476_v14 = vsel %vm467_vm1, %v4658_v12, 1065369472  ;;  %v478_v15 = vsel %vm467_vm1, %v4663_v13, 1065369472  ;;  %v4673_v16 = vld [vmem:[%s6200_s0 + $0x28] sm:$0xff]   ;;  %v4679_v17 = vld [vmem:[%s6200_s0 + $0x30] sm:$0xff]  }
   0x5   :  { %4098 = vmatpush3.bf16.msra.mxu0 %v750_v3  ;;  %4510 = vmatpush3.bf16.msra.mxu1 %v750_v3  ;;  %v4684_v18 = vld [vmem:[%s6200_s0 + $0x100] sm:$0xff]   ;;  %v4689_v19 = vld [vmem:[%s6200_s0 + $0x108] sm:$0xff]   ;;  %v480_v20 = vsel %vm467_vm1, %v4673_v16, 1065369472  ;;  %v482_v23 = vsel %vm467_vm1, %v4679_v17, 1065369472 }
   0x6   :  { %4099 = vmatprep.subr.bf16.mxu0 %v4516_v4  ;;  %4508 = vmatprep.subr.bf16.mxu1 %v4516_v4  ;;  %v534_v21 = vsel %vm467_vm1, %v4684_v18, 1065369472  ;;  %v536_v22 = vsel %vm467_vm1, %v4689_v19, 1065369472  ;;  %v4703_v24 = vld [vmem:[%s6200_s0 + $0x38] sm:$0xff]   ;;  %v4712_v26 = vld [vmem:[%s6200_s0 + $0x110] sm:$0xff]  }
   0x7   :  { %4167 = vmatprep.mubr.msk.bf16.mxu1 %vm617_vm2, %v534_v21  ;;  %v4540_v25 = vld [vmem:[%s6201_s2 + $0x20] ss:$0 sps:$4 sm:$0x11]   ;;  %v4718_v27 = vld [vmem:[%s6200_s0 + $0x118] sm:$0xff]   ;;  %v538_v29 = vsel %vm467_vm1, %v4712_v26, 1065369472  ;;  %2460 = vrot.lane.b32.xlu0 %v4642_v8, %s4593_s24 }
   0x8   :  { %v1719_v28 = vand.u32 %v4540_v25, %v4622_v2  ;;  %v4727_v30 = vld [vmem:[%s6200_s0 + $0x40] sm:$0xff]   ;;  %v540_v31 = vsel %vm467_vm1, %v4718_v27, 1065369472  ;;  %v484_v32 = vsel %vm467_vm1, %v4703_v24, 1065369472  ;;  %v4748_v36 = vld [vmem:[%s6200_s0 + $0x128] sm:$0xff]   ;;  %2464 = vrot.lane.b32.xlu1 %v4658_v12, %s4593_s24 }
   0x9   :  { %4100 = vmatpush3.bf16.msra.mxu0 %v4516_v4  ;;  %4511 = vmatpush3.bf16.msra.mxu1 %v4516_v4  ;;  %v4737_v33 = vld [vmem:[%s6200_s0 + $0x120] sm:$0xff]   ;;  %v486_v34 = vsel %vm467_vm1, %v4727_v30, 1065369472  ;;  %v4755_v37 = vld [vmem:[%s6200_s0 + $0x48] sm:$0xff]   ;;  %v4760_v38 = vld [vmem:[%s6200_s0 + $0x130] sm:$0xff]   ;;  %vm3490_vm4 = vcmask 7168  }
   0xa   :  { %4101 = vmatprep.subr.bf16.mxu0 %v4517_v7  ;;  %4509 = vmatprep.subr.bf16.mxu1 %v4517_v7  ;;  %v542_v35 = vsel %vm467_vm1, %v4737_v33, 1065369472  ;;  %v4765_v39 = vld [vmem:[%s6200_s0 + $0x50] sm:$0xff]   ;;  %v544_v40 = vsel %vm467_vm1, %v4748_v36, 1065369472  ;;  %v4554_v44 = vld [vmem:[%s6201_s2 + $0x18] sm:$0xff]  }
   0xb   :  { %v546_v41 = vsel %vm467_vm1, %v4760_v38, 1065369472  ;;  %v488_v42 = vsel %vm467_vm1, %v4755_v37, 1065369472  ;;  %v490_v43 = vsel %vm467_vm1, %v4765_v39, 1065369472  ;;  %2466 = vrot.lane.b32.xlu0 %v4663_v13, %s4593_s24 }
   0xc   :  { %v4783_v45 = vld [vmem:[%s6200_s0 + $0x138] sm:$0xff]   ;;  %v4794_v47 = vld [vmem:[%s6200_s0 + $0x140] sm:$0xff]   ;;  %v4815_v53 = vld [vmem:[%s6200_s0 + $0x148] sm:$0xff]   ;;  %2468 = vrot.lane.b32.xlu1 %v4673_v16, %s4593_s24 }
   0xd   :  { %4102 = vmatpush3.bf16.msra.mxu0 %v4517_v7  ;;  %4512 = vmatpush3.bf16.msra.mxu1 %v4517_v7  ;;  %v4789_v46 = vld [vmem:[%s6200_s0 + $0x58] sm:$0xff]   ;;  %v4800_v48 = vld [vmem:[%s6200_s0 + $0x60] sm:$0xff]   ;;  %v548_v49 = vsel %vm467_vm1, %v4783_v45, 1065369472  ;;  %v550_v50 = vsel %vm467_vm1, %v4794_v47, 1065369472 }
   0xe   :  { %4231 = vmatprep.subr.bf16.mxu1 %v1719_v28  ;;  %v492_v51 = vsel %vm467_vm1, %v4789_v46, 1065369472  ;;  %v494_v52 = vsel %vm467_vm1, %v4800_v48, 1065369472  ;;  %v4821_v54 = vld [vmem:[%s6200_s0 + $0x150] sm:$0xff]   ;;  %v4827_v55 = vld [vmem:[%s6200_s0 + $0x68] sm:$0xff]  }
   0xf   :  { %v4832_v56 = vld [vmem:[%s6200_s0 + $0x70] sm:$0xff]   ;;  %v552_v57 = vsel %vm467_vm1, %v4815_v53, 1065369472  ;;  %v554_v58 = vsel %vm467_vm1, %v4821_v54, 1065369472  ;;  %v4847_v61 = vld [vmem:[%s6200_s0 + $0x158] sm:$0xff]   ;;  %2470 = vrot.lane.b32.xlu0 %v4679_v17, %s4593_s24 }
  0x10   :  { %4104 = vmatmul.mubr.msk.bf16.vlgmr.msra.gmra.mxu0 %vm617_vm2, %v472_v10  ;;  %4168 = vmatmul.mubr.msk.bf16.vlgmr.msra.gmra.mxu1 %vm617_vm2, %v536_v22  ;;  %v496_v59 = vsel %vm467_vm1, %v4827_v55, 1065369472  ;;  %v498_v60 = vsel %vm467_vm1, %v4832_v56, 1065369472  ;;  %v4568_v62 = vld [vmem:[%s6201_s2 + $0x10] sm:$0xff]   ;;  %v4856_v63 = vld [vmem:[%s6200_s0 + $0x160] sm:$0xff]  }
  0x11   :  { %4107 = vmatprep.mubr.msk.bf16.mxu0 %vm617_vm2, %v474_v11  ;;  %4171 = vmatprep.mubr.msk.bf16.mxu1 %vm617_vm2, %v538_v29  ;;  %v4862_v0 = vld [vmem:[%s6200_s0 + $0x78] sm:$0xff]   ;;  %v4867_v1 = vld [vmem:[%s6200_s0 + $0x80] sm:$0xff]   ;;  %v556_v3 = vsel %vm467_vm1, %v4847_v61, 1065369472  ;;  %v558_v4 = vsel %vm467_vm1, %v4856_v63, 1065369472 }
  0x12   :  { %4232 = vmatpush3.bf16.msra.mxu1 %v1719_v28  ;;  %v500_v6 = vsel %vm467_vm1, %v4862_v0, 1065369472  ;;  %v502_v7 = vsel %vm467_vm1, %v4867_v1, 1065369472  ;;  %v4882_v10 = vld [vmem:[%s6200_s0 + $0x168] sm:$0xff]   ;;  %v4916_v28 = vld [vmem:[%s6200_s0 + $0x178] sm:$0xff]   ;;  %2472 = vrot.lane.b32.xlu1 %v4703_v24, %s4593_s24 }
  0x13   :  { %4233 = vmatprep.subr.bf16.mxu1 %v4554_v44  ;;  %v4888_v11 = vld [vmem:[%s6200_s0 + $0x88] sm:$0xff]   ;;  %v560_v21 = vsel %vm467_vm1, %v4882_v10, 1065369472  ;;  %v4922_v29 = vld [vmem:[%s6200_s0 + $0x180] sm:$0xff]   ;;  %2474 = vrot.lane.b32.xlu0 %v4727_v30, %s4593_s24 }
  0x16   :  { %4234 = vmatpush3.bf16.msra.mxu1 %v4554_v44  ;;  %v4958_v44 = vld [vmem:[%s6200_s0 + $0x190] sm:$0xff]   ;;  %2476 = vrot.lane.b32.xlu1 %v4755_v37, %s4593_s24 }
  0x17   :  { %4235 = vmatprep.subr.bf16.mxu1 %v4568_v62  ;;  %2478 = vrot.lane.b32.xlu0 %v4765_v39, %s4593_s24 }
  0x18   :  { %4108 = vmatmul.mubr.msk.bf16.gmra.mxu0 %vm617_vm2, %v476_v14  ;;  %4172 = vmatmul.mubr.msk.bf16.gmra.mxu1 %vm617_vm2, %v540_v31  ;;  %v4893_v14 = vld [vmem:[%s6200_s0 + $0x170] sm:$0xff]   ;;  %v4929_v31 = vld [vmem:[%s6200_s0 + $0x98] sm:$0xff]  }
  0x19   :  { %4111 = vmatprep.mubr.msk.bf16.mxu0 %vm617_vm2, %v478_v15  ;;  %4175 = vmatprep.mubr.msk.bf16.mxu1 %vm617_vm2, %v542_v35  ;;  %v4575_v15 = vld [vmem:[%s6201_s2 + $0x8] sm:$0xff]   ;;  %v562_v22 = vsel %vm467_vm1, %v4893_v14, 1065369472  ;;  %v564_v35 = vsel %vm467_vm1, %v4916_v28, 1065369472 }
  0x1a   :  { %4236 = vmatpush3.bf16.msra.mxu1 %v4568_v62  ;;  %v4996_v62 = vld [vmem:[%s6200_s0 + $0xb8] sm:$0xff]   ;;  %2480 = vrot.lane.b32.xlu1 %v4789_v46, %s4593_s24 }
  0x1b   :  { %4237 = vmatprep.subr.bf16.mxu1 %v4575_v15  ;;  %2482 = vrot.lane.b32.xlu0 %v4800_v48, %s4593_s24 }
  0x1e   :  { %4238 = vmatpush3.bf16.msra.mxu1 %v4575_v15  ;;  %2484 = vrot.lane.b32.xlu1 %v4827_v55, %s4593_s24  ;;  %v4589_v55 = vld [vmem:[%s6202_s3 + $0x10] sm:$0xff]  }
  0x1f   :  { %2486 = vrot.lane.b32.xlu0 %v4832_v56, %s4593_s24 }
  0x20   :  { %4112 = vmatmul.mubr.msk.bf16.gmra.mxu0 %vm617_vm2, %v480_v20  ;;  %4176 = vmatmul.mubr.msk.bf16.gmra.mxu1 %vm617_vm2, %v544_v40  ;;  %v4902_v20 = vld [vmem:[%s6200_s0 + $0x90] sm:$0xff]   ;;  %v566_v40 = vsel %vm467_vm1, %v4922_v29, 1065369472 }
  0x21   :  { %4115 = vmatprep.mubr.msk.bf16.mxu0 %vm617_vm2, %v482_v23  ;;  %4179 = vmatprep.mubr.msk.bf16.mxu1 %vm617_vm2, %v546_v41  ;;  %v504_v23 = vsel %vm467_vm1, %v4888_v11, 1065369472  ;;  %v506_v25 = vsel %vm467_vm1, %v4902_v20, 1065369472  ;;  %v508_v41 = vsel %vm467_vm1, %v4929_v31, 1065369472 }
  0x22   :  { %2488 = vrot.lane.b32.xlu1 %v4862_v0, %s4593_s24 }
  0x23   :  { %2490 = vrot.lane.b32.xlu0 %v4867_v1, %s4593_s24 }
  0x26   :  { %2492 = vrot.lane.b32.xlu1 %v4888_v11, %s4593_s24 }
  0x27   :  { %2494 = vrot.lane.b32.xlu0 %v4902_v20, %s4593_s24 }
  0x28   :  { %4116 = vmatmul.mubr.msk.bf16.gmra.mxu0 %vm617_vm2, %v484_v32  ;;  %4180 = vmatmul.mubr.msk.bf16.gmra.mxu1 %vm617_vm2, %v548_v49  ;;  %v4582_v32 = vld [vmem:[%s6201_s2] sm:$0xff]   ;;  %v4964_v49 = vld [vmem:[%s6200_s0 + $0xa8] sm:$0xff]  }
  0x29   :  { %4119 = vmatprep.mubr.msk.bf16.mxu0 %vm617_vm2, %v486_v34  ;;  %4183 = vmatprep.mubr.msk.bf16.mxu1 %vm617_vm2, %v550_v50  ;;  %v4937_v34 = vld [vmem:[%s6200_s0 + $0xa0] sm:$0xff]   ;;  %v4969_v50 = vld [vmem:[%s6200_s0 + $0xb0] sm:$0xff]  }
  0x2a   :  { %4239 = vmatprep.subr.bf16.mxu1 %v4582_v32  ;;  %2496 = vrot.lane.b32.xlu1 %v4929_v31, %s4593_s24 }
  0x2b   :  { %4240 = vmatpush3.bf16.msra.mxu1 %v4582_v32  ;;  %2498 = vrot.lane.b32.xlu0 %v4937_v34, %s4593_s24 }
  0x2e   :  { %2500 = vrot.lane.b32.xlu1 %v4964_v49, %s4593_s24 }
  0x2f   :  { %2502 = vrot.lane.b32.xlu0 %v4969_v50, %s4593_s24 }
  0x30   :  { %4120 = vmatmul.mubr.msk.bf16.gmra.mxu0 %vm617_vm2, %v488_v42  ;;  %4184 = vmatmul.mubr.msk.bf16.gmra.mxu1 %vm617_vm2, %v552_v57  ;;  %v510_v42 = vsel %vm467_vm1, %v4937_v34, 1065369472  ;;  %v512_v57 = vsel %vm467_vm1, %v4964_v49, 1065369472 }
  0x31   :  { %4123 = vmatprep.mubr.msk.bf16.mxu0 %vm617_vm2, %v490_v43  ;;  %4187 = vmatprep.mubr.msk.bf16.mxu1 %vm617_vm2, %v554_v58  ;;  %v4952_v43 = vld [vmem:[%s6200_s0 + $0x188] sm:$0xff]   ;;  %v514_v58 = vsel %vm467_vm1, %v4969_v50, 1065369472 }
  0x32   :  { %2504 = vrot.lane.b32.xlu1 %v4996_v62, %s4593_s24 }
  0x38   :  { %4124 = vmatmul.mubr.msk.bf16.gmra.mxu0 %vm617_vm2, %v492_v51  ;;  %4188 = vmatmul.mubr.msk.bf16.gmra.mxu1 %vm617_vm2, %v556_v3  ;;  %v568_v51 = vsel %vm467_vm1, %v4952_v43, 1065369472  ;;  %v5001_v3 = vld [vmem:[%s6200_s0 + $0xc0] sm:$0xff]  }
  0x39   :  { %4127 = vmatprep.mubr.msk.bf16.mxu0 %vm617_vm2, %v494_v52  ;;  %4191 = vmatprep.mubr.msk.bf16.mxu1 %vm617_vm2, %v558_v4  ;;  %v570_v52 = vsel %vm467_vm1, %v4958_v44, 1065369472  ;;  %v518_v15 = vsel %vm467_vm1, %v5001_v3, 1065369472 }
  0x3a   :  { %2506 = vrot.lane.b32.xlu0 %v5001_v3, %s4593_s24 }
  0x40   :  { %4128 = vmatmul.mubr.msk.bf16.gmra.mxu0 %vm617_vm2, %v496_v59  ;;  %4192 = vmatmul.mubr.msk.bf16.gmra.mxu1 %vm617_vm2, %v560_v21  ;;  %v4984_v59 = vld [vmem:[%s6200_s0 + $0x198] sm:$0xff]   ;;  %v5016_v21 = vld [vmem:[%s6200_s0 + $0x1a8] sm:$0xff]  }
  0x41   :  { %4131 = vmatprep.mubr.msk.bf16.mxu0 %vm617_vm2, %v498_v60  ;;  %4195 = vmatprep.mubr.msk.bf16.mxu1 %vm617_vm2, %v562_v22  ;;  %v4990_v60 = vld [vmem:[%s6200_s0 + $0x1a0] sm:$0xff]   ;;  %v572_v4 = vsel %vm467_vm1, %v4984_v59, 1065369472  ;;  %v5022_v22 = vld [vmem:[%s6200_s0 + $0x1b0] sm:$0xff]   ;;  %v576_v32 = vsel %vm467_vm1, %v5016_v21, 1065369472 }
  0x48   :  { %4132 = vmatmul.mubr.msk.bf16.gmra.mxu0 %vm617_vm2, %v500_v6  ;;  %4196 = vmatmul.mubr.msk.bf16.gmra.mxu1 %vm617_vm2, %v564_v35  ;;  %v574_v6 = vsel %vm467_vm1, %v4990_v60, 1065369472  ;;  %v578_v35 = vsel %vm467_vm1, %v5022_v22, 1065369472 }
  0x49   :  { %4135 = vmatprep.mubr.msk.bf16.mxu0 %vm617_vm2, %v502_v7  ;;  %4199 = vmatprep.mubr.msk.bf16.mxu1 %vm617_vm2, %v566_v40  ;;  %v516_v7 = vsel %vm467_vm1, %v4996_v62, 1065369472 }
  0x50   :  { %4136 = vmatmul.mubr.msk.bf16.gmra.mxu0 %vm617_vm2, %v504_v23  ;;  %4200 = vmatmul.mubr.msk.bf16.gmra.mxu1 %vm617_vm2, %v568_v51  ;;  %v5028_v23 = vld [vmem:[%s6200_s0 + $0xc8] sm:$0xff]   ;;  %v5054_v51 = vld [vmem:[%s6200_s0 + $0x1c0] sm:$0xff]  }
  0x51   :  { %4139 = vmatprep.mubr.msk.bf16.mxu0 %vm617_vm2, %v506_v25  ;;  %4203 = vmatprep.mubr.msk.bf16.mxu1 %vm617_vm2, %v570_v52  ;;  %v5033_v25 = vld [vmem:[%s6200_s0 + $0xd0] sm:$0xff]   ;;  %v520_v40 = vsel %vm467_vm1, %v5028_v23, 1065369472  ;;  %v5060_v52 = vld [vmem:[%s6200_s0 + $0xd8] sm:$0xff]  }
  0x52   :  { %2508 = vrot.lane.b32.xlu1 %v5028_v23, %s4593_s24  ;;  %2510 = vrot.lane.b32.xlu0 %v5033_v25, %s4593_s24 }
  0x56   :  { %2512 = vrot.lane.b32.xlu1 %v5060_v52, %s4593_s24 }
  0x58   :  { %4140 = vmatmul.mubr.msk.bf16.gmra.mxu0 %vm617_vm2, %v508_v41  ;;  %4204 = vmatmul.mubr.msk.bf16.gmra.mxu1 %vm617_vm2, %v572_v4  ;;  %v522_v41 = vsel %vm467_vm1, %v5033_v25, 1065369472  ;;  %v582_v4 = vsel %vm467_vm1, %v5054_v51, 1065369472 }
  0x59   :  { %4143 = vmatprep.mubr.msk.bf16.mxu0 %vm617_vm2, %v510_v42  ;;  %4207 = vmatprep.mubr.msk.bf16.mxu1 %vm617_vm2, %v574_v6  ;;  %v5048_v42 = vld [vmem:[%s6200_s0 + $0x1b8] sm:$0xff]   ;;  %v524_v6 = vsel %vm467_vm1, %v5060_v52, 1065369472 }
  0x60   :  { %4144 = vmatmul.mubr.msk.bf16.gmra.mxu0 %vm617_vm2, %v512_v57  ;;  %4208 = vmatmul.mubr.msk.bf16.gmra.mxu1 %vm617_vm2, %v576_v32  ;;  %v5065_v57 = vld [vmem:[%s6200_s0 + $0xe0] sm:$0xff]   ;;  %v5086_v32 = vld [vmem:[%s6200_s0 + $0x1d0] sm:$0xff]  }
  0x61   :  { %4147 = vmatprep.mubr.msk.bf16.mxu0 %vm617_vm2, %v514_v58  ;;  %4211 = vmatprep.mubr.msk.bf16.mxu1 %vm617_vm2, %v578_v35  ;;  %v580_v58 = vsel %vm467_vm1, %v5048_v42, 1065369472  ;;  %6211 = vst [vmem:[#allocation3_spill] sm:$0xff] %v5086_v32  ;;  %v5092_v35 = vld [vmem:[%s6200_s0 + $0xe8] sm:$0xff]  }
  0x62   :  { %2514 = vrot.lane.b32.xlu0 %v5065_v57, %s4593_s24  ;;  %2516 = vrot.lane.b32.xlu1 %v5092_v35, %s4593_s24 }
  0x68   :  { %4148 = vmatmul.mubr.msk.bf16.gmra.mxu0 %vm617_vm2, %v516_v7  ;;  %v526_v7 = vsel %vm467_vm1, %v5065_v57, 1065369472  ;;  %4212 = vmatmul.mubr.msk.bf16.gmra.mxu1 %vm617_vm2, %v580_v58  ;;  %v586_v58 = vsel %vm467_vm1, %v5086_v32, 1065369472  ;;  %v5118_v32 = vld [vmem:[%s6200_s0 + $0x1e0] sm:$0xff]  }
  0x69   :  { %4151 = vmatprep.mubr.msk.bf16.mxu0 %vm617_vm2, %v518_v15  ;;  %4215 = vmatprep.mubr.msk.bf16.mxu1 %vm617_vm2, %v582_v4  ;;  %v5080_v15 = vld [vmem:[%s6200_s0 + $0x1c8] sm:$0xff]   ;;  %v528_v4 = vsel %vm467_vm1, %v5092_v35, 1065369472  ;;  %6213 = vst [vmem:[#allocation5_spill] sm:$0xff] %v5118_v32 }
  0x6a   :  { %6210 = vst [vmem:[#allocation2_spill] sm:$0xff] %v5080_v15 }
  0x70   :  { %4152 = vmatmul.mubr.msk.bf16.gmra.mxu0 %vm617_vm2, %v520_v40  ;;  %v5097_v40 = vld [vmem:[%s6200_s0 + $0xf0] sm:$0xff]  }
  0x71   :  { %4155 = vmatprep.mubr.msk.bf16.mxu0 %vm617_vm2, %v522_v41  ;;  %v584_v41 = vsel %vm467_vm1, %v5080_v15, 1065369472  ;;  %v590_v15 = vsel %vm467_vm1, %v5118_v32, 1065369472  ;;  %2518 = vrot.lane.b32.xlu0 %v5097_v40, %s4593_s24 }
  0x72   :  { %4216 = vmatmul.mubr.msk.bf16.gmra.mxu1 %vm617_vm2, %v584_v41  ;;  %v5124_v41 = vld [vmem:[%s6200_s0 + $0xf8] sm:$0xff]  }
  0x73   :  { %4219 = vmatprep.mubr.msk.bf16.mxu1 %vm617_vm2, %v586_v58  ;;  %2520 = vrot.lane.b32.xlu1 %v5124_v41, %s4593_s24 }
  0x75   :  { %2522 = vrot.lane.b32.xlu0 %v4684_v18, %s4593_s24 }
  0x77   :  { %2524 = vrot.lane.b32.xlu1 %v4689_v19, %s4593_s24 }
  0x78   :  { %4156 = vmatmul.mubr.msk.bf16.gmra.mxu0 %vm617_vm2, %v524_v6  ;;  %v530_v6 = vsel %vm467_vm1, %v5097_v40, 1065369472 }
  0x79   :  { %4159 = vmatprep.mubr.msk.bf16.mxu0 %vm617_vm2, %v526_v7  ;;  %v5112_v7 = vld [vmem:[%s6200_s0 + $0x1d8] sm:$0xff]   ;;  %2526 = vrot.lane.b32.xlu0 %v4712_v26, %s4593_s24 }
  0x7a   :  { %6212 = vst [vmem:[#allocation4_spill] sm:$0xff] %v5112_v7  ;;  %v588_v58 = vsel %vm467_vm1, %v5112_v7, 1065369472  ;;  %v5143_v7 = vld [vmem:[%s6200_s0 + $0x1f0] sm:$0xff]  }
  0x7b   :  { %4220 = vmatmul.mubr.msk.bf16.gmra.mxu1 %vm617_vm2, %v588_v58  ;;  %6215 = vst [vmem:[#allocation7_spill] sm:$0xff] %v5143_v7  ;;  %v594_v58 = vsel %vm467_vm1, %v5143_v7, 1065369472  ;;  %2528 = vrot.lane.b32.xlu1 %v4718_v27, %s4593_s24 }
  0x7c   :  { %4223 = vmatprep.mubr.msk.bf16.mxu1 %vm617_vm2, %v590_v15  ;;  %v5154_v15 = vld [vmem:[%s6200_s0 + $0x1f8] sm:$0xff]  }
  0x7d   :  { %2530 = vrot.lane.b32.xlu0 %v4737_v33, %s4593_s24 }
  0x7f   :  { %2532 = vrot.lane.b32.xlu1 %v4748_v36, %s4593_s24 }
  0x80   :  { %4160 = vmatmul.mubr.msk.bf16.gmra.mxu0 %vm617_vm2, %v528_v4  ;;  %v532_v4 = vsel %vm467_vm1, %v5124_v41, 1065369472 }
  0x81   :  { %4163 = vmatprep.mubr.msk.bf16.mxu0 %vm617_vm2, %v530_v6  ;;  %v5137_v6 = vld [vmem:[%s6200_s0 + $0x1e8] sm:$0xff]   ;;  %2534 = vrot.lane.b32.xlu0 %v4760_v38, %s4593_s24 }
  0x82   :  { %6214 = vst [vmem:[#allocation6_spill] sm:$0xff] %v5137_v6  ;;  %v592_v32 = vsel %vm467_vm1, %v5137_v6, 1065369472  ;;  %v4587_v6 = vld [vmem:[%s6202_s3 + $0x20] ss:$0 sps:$4 sm:$0x11]  }
  0x83   :  { %4224 = vmatmul.mubr.msk.bf16.gmra.mxu1 %vm617_vm2, %v592_v32  ;;  %v2943_v7 = vand.u32 %v4587_v6, %v4622_v2  ;;  %v4588_v2 = vld [vmem:[%s6202_s3 + $0x18] sm:$0xff]   ;;  %2536 = vrot.lane.b32.xlu1 %v4783_v45, %s4593_s24 }
  0x84   :  { %4227 = vmatprep.mubr.msk.bf16.mxu1 %vm617_vm2, %v594_v58 }
  0x85   :  { %4369 = vmatprep.subr.bf16.mxu0 %v2943_v7  ;;  %2538 = vrot.lane.b32.xlu0 %v4794_v47, %s4593_s24 }
  0x86   :  { %4370 = vmatpush3.bf16.msra.mxu0 %v2943_v7 }
  0x87   :  { %4371 = vmatprep.subr.bf16.mxu0 %v4588_v2  ;;  %2540 = vrot.lane.b32.xlu1 %v4815_v53, %s4593_s24 }
  0x88   :  { %4164 = vmatmul.mubr.msk.bf16.gmra.mxu0 %vm617_vm2, %v532_v4  ;;  %v596_v4 = vsel %vm467_vm1, %v5154_v15, 1065369472 }
  0x89   :  { %2542 = vrot.lane.b32.xlu0 %v4821_v54, %s4593_s24 }
  0x8a   :  { %4372 = vmatpush3.bf16.msra.mxu0 %v4588_v2 }
  0x8b   :  { %4228 = vmatmul.mubr.msk.bf16.gmra.mxu1 %vm617_vm2, %v596_v4  ;;  %4373 = vmatprep.subr.bf16.mxu0 %v4589_v55 }
  0x8c   :  { %2544 = vrot.lane.b32.xlu1 %v4847_v61, %s4593_s24 }
  0x8d   :  { %2546 = vrot.lane.b32.xlu0 %v4856_v63, %s4593_s24 }
  0x8e   :  { %4374 = vmatpush3.bf16.msra.mxu0 %v4589_v55 }
  0x90   :  { %2548 = vrot.lane.b32.xlu1 %v4882_v10, %s4593_s24 }
  0x91   :  { %2550 = vrot.lane.b32.xlu0 %v4893_v14, %s4593_s24 }
  0x94   :  { %2552 = vrot.lane.b32.xlu1 %v4916_v28, %s4593_s24 }
  0x95   :  { %2554 = vrot.lane.b32.xlu0 %v4922_v29, %s4593_s24 }
  0x98   :  { %2556 = vrot.lane.b32.xlu1 %v4952_v43, %s4593_s24 }
  0x99   :  { %2558 = vrot.lane.b32.xlu0 %v4958_v44, %s4593_s24 }
  0x9c   :  { %2560 = vrot.lane.b32.xlu1 %v4984_v59, %s4593_s24 }
  0x9d   :  { %2562 = vrot.lane.b32.xlu0 %v4990_v60, %s4593_s24 }
  0xa0   :  { %2564 = vrot.lane.b32.xlu1 %v5016_v21, %s4593_s24 }
  0xa1   :  { %2566 = vrot.lane.b32.xlu0 %v5022_v22, %s4593_s24  ;;  %v6216_v22 = vld [vmem:[#allocation2_spill] sm:$0xff] }
  0xa4   :  { %2568 = vrot.lane.b32.xlu1 %v5048_v42, %s4593_s24 }
  0xa5   :  { %2570 = vrot.lane.b32.xlu0 %v5054_v51, %s4593_s24 }
  0xa8   :  { %2572 = vrot.lane.b32.xlu1 %v6216_v22, %s4593_s24 }
  0xd0   :  { %v4105_v5 = vpop.f32.mrf.mxu0  ;;  %v5219_v1 = vpop.f32.mrf.mxu1 }
  0xd1   :  { %v1299_v24 = vmax.f32 %v4105_v5, 0.0 }
  0xd2   :  { %v786_v8 = vpop.f32.mrf.mxu0  ;;  %v5225_v49 = vpop.f32.mrf.mxu1 }
  0xd3   :  { %v1297_v16 = vmax.f32 %v786_v8, 0.0 }
  0xd4   :  { %v4106_v9 = vpop.f32.mrf.mxu0  ;;  %v5227_v7 = vpop.f32.mrf.mxu1 }
  0xd5   :  { %v1300_v12 = vmax.f32 %v4106_v9, 0.0 }
  0xd6   :  { %v789_v13 = vpop.f32.mrf.mxu0  ;;  %v5235_v23 = vpop.f32.mrf.mxu1 }
  0xd7   :  { %v1298_v17 = vmax.f32 %v789_v13, 0.0  ;;  %v1426_v39 = vpack.c.bf16 %v1300_v12, %v1299_v24 }
  0xd8   :  { %v4109_v30 = vpop.f32.mrf.mxu0  ;;  %v5237_v4 = vpop.f32.mrf.mxu1 }
  0xd9   :  { %v1425_v37 = vpack.c.bf16 %v1298_v17, %v1297_v16  ;;  %v1303_v31 = vmax.f32 %v4109_v30, 0.0 }
  0xda   :  { %v802_v46 = vpop.f32.mrf.mxu0  ;;  %v5243_v52 = vpop.f32.mrf.mxu1 }
  0xdb   :  { %4241 = vmatprep.mubr.msk.bf16.mxu1 %vm1525_vm3, %v1425_v37  ;;  %v1301_v11 = vmax.f32 %v802_v46, 0.0 }
  0xdc   :  { %v4110_v48 = vpop.f32.mrf.mxu0  ;;  %4242 = vmatmul.mubr.msk.bf16.vlgmr.msra.gmra.mxu1 %vm1525_vm3, %v1426_v39  ;;  %v5245_v16 = vpop.f32.mrf.mxu1 }
  0xdd   :  { %v1304_v56 = vmax.f32 %v4110_v48, 0.0 }
  0xde   :  { %v805_v0 = vpop.f32.mrf.mxu0  ;;  %v5253_v35 = vpop.f32.mrf.mxu1 }
  0xdf   :  { %v1302_v20 = vmax.f32 %v805_v0, 0.0  ;;  %v1428_v62 = vpack.c.bf16 %v1304_v56, %v1303_v31 }
  0xe0   :  { %v4113_v34 = vpop.f32.mrf.mxu0  ;;  %v5255_v30 = vpop.f32.mrf.mxu1 }
  0xe1   :  { %v1427_v50 = vpack.c.bf16 %v1302_v20, %v1301_v11  ;;  %v1307_v25 = vmax.f32 %v4113_v34, 0.0  ;;  %v4590_v11 = vld [vmem:[%s6202_s3 + $0x8] sm:$0xff]  }
  0xe2   :  { %v818_v32 = vpop.f32.mrf.mxu0  ;;  %v5261_v41 = vpop.f32.mrf.mxu1  ;;  %4375 = vmatprep.subr.bf16.mxu0 %v4590_v11 }
  0xe3   :  { %4245 = vmatprep.mubr.msk.bf16.mxu1 %vm1525_vm3, %v1427_v50  ;;  %v1305_v2 = vmax.f32 %v818_v32, 0.0  ;;  %4376 = vmatpush3.bf16.msra.mxu0 %v4590_v11 }
  0xe4   :  { %v4114_v3 = vpop.f32.mrf.mxu0  ;;  %4246 = vmatmul.mubr.msk.bf16.gmra.mxu1 %vm1525_vm3, %v1428_v62  ;;  %v5263_v0 = vpop.f32.mrf.mxu1 }
  0xe5   :  { %v1308_v6 = vmax.f32 %v4114_v3, 0.0 }
  0xe6   :  { %v821_v58 = vpop.f32.mrf.mxu0  ;;  %v5271_v19 = vpop.f32.mrf.mxu1 }
  0xe7   :  { %v1306_v5 = vmax.f32 %v821_v58, 0.0  ;;  %v1430_v12 = vpack.c.bf16 %v1308_v6, %v1307_v25 }
  0xe8   :  { %v4117_v8 = vpop.f32.mrf.mxu0  ;;  %v5276_v34 = vpop.f32.mrf.mxu1 }
  0xe9   :  { %v1429_v9 = vpack.c.bf16 %v1306_v5, %v1305_v2  ;;  %v1311_v40 = vmax.f32 %v4117_v8, 0.0 }
  0xea   :  { %v834_v13 = vpop.f32.mrf.mxu0  ;;  %v5282_v32 = vpop.f32.mrf.mxu1 }
  0xeb   :  { %4249 = vmatprep.mubr.msk.bf16.mxu1 %vm1525_vm3, %v1429_v9  ;;  %v1309_v37 = vmax.f32 %v834_v13, 0.0 }
  0xec   :  { %v4118_v57 = vpop.f32.mrf.mxu0  ;;  %4250 = vmatmul.mubr.msk.bf16.gmra.mxu1 %vm1525_vm3, %v1430_v12  ;;  %v5284_v2 = vpop.f32.mrf.mxu1 }
  0xed   :  { %v1312_v17 = vmax.f32 %v4118_v57, 0.0 }
  0xee   :  { %v837_v24 = vpop.f32.mrf.mxu0  ;;  %v5292_v36 = vpop.f32.mrf.mxu1 }
  0xef   :  { %v1310_v39 = vmax.f32 %v837_v24, 0.0  ;;  %v1432_v55 = vpack.c.bf16 %v1312_v17, %v1311_v40 }
  0xf0   :  { %v4121_v46 = vpop.f32.mrf.mxu0  ;;  %v5294_v8 = vpop.f32.mrf.mxu1 }
  0xf1   :  { %v1431_v48 = vpack.c.bf16 %v1310_v39, %v1309_v37  ;;  %v1315_v27 = vmax.f32 %v4121_v46, 0.0 }
  0xf2   :  { %v850_v56 = vpop.f32.mrf.mxu0  ;;  %v5300_v45 = vpop.f32.mrf.mxu1 }
  0xf3   :  { %4253 = vmatprep.mubr.msk.bf16.mxu1 %vm1525_vm3, %v1431_v48  ;;  %v1313_v26 = vmax.f32 %v850_v56, 0.0 }
  0xf4   :  { %v4122_v18 = vpop.f32.mrf.mxu0  ;;  %4254 = vmatmul.mubr.msk.bf16.gmra.mxu1 %vm1525_vm3, %v1432_v55  ;;  %v5302_v37 = vpop.f32.mrf.mxu1 }
  0xf5   :  { %v1316_v20 = vmax.f32 %v4122_v18, 0.0 }
  0xf6   :  { %v853_v31 = vpop.f32.mrf.mxu0  ;;  %v5310_v53 = vpop.f32.mrf.mxu1 }
  0xf7   :  { %v1314_v50 = vmax.f32 %v853_v31, 0.0  ;;  %v1434_v6 = vpack.c.bf16 %v1316_v20, %v1315_v27 }
  0xf8   :  { %v4125_v62 = vpop.f32.mrf.mxu0  ;;  %v5312_v46 = vpop.f32.mrf.mxu1 }
  0xf9   :  { %v1433_v3 = vpack.c.bf16 %v1314_v50, %v1313_v26  ;;  %v1319_v38 = vmax.f32 %v4125_v62, 0.0  ;;  %v4591_v26 = vld [vmem:[%s6202_s3] sm:$0xff]  }
  0xfa   :  { %v866_v58 = vpop.f32.mrf.mxu0  ;;  %v5318_v61 = vpop.f32.mrf.mxu1  ;;  %4377 = vmatprep.subr.bf16.mxu0 %v4591_v26 }
  0xfb   :  { %4257 = vmatprep.mubr.msk.bf16.mxu1 %vm1525_vm3, %v1433_v3  ;;  %v1317_v9 = vmax.f32 %v866_v58, 0.0  ;;  %4378 = vmatpush3.bf16.msra.mxu0 %v4591_v26 }
  0xfc   :  { %v4126_v33 = vpop.f32.mrf.mxu0  ;;  %4258 = vmatmul.mubr.msk.bf16.gmra.mxu1 %vm1525_vm3, %v1434_v6  ;;  %v5320_v31 = vpop.f32.mrf.mxu1 }
  0xfd   :  { %v1320_v5 = vmax.f32 %v4126_v33, 0.0 }
  0xfe   :  { %v869_v25 = vpop.f32.mrf.mxu0  ;;  %v5328_v10 = vpop.f32.mrf.mxu1 }
  0xff   :  { %v1318_v12 = vmax.f32 %v869_v25, 0.0  ;;  %v1436_v17 = vpack.c.bf16 %v1320_v5, %v1319_v38 }
 0x100   :  { %v4129_v13 = vpop.f32.mrf.mxu0  ;;  %v5333_v62 = vpop.f32.mrf.mxu1 }
 0x101   :  { %v1435_v57 = vpack.c.bf16 %v1318_v12, %v1317_v9  ;;  %v1323_v54 = vmax.f32 %v4129_v13, 0.0 }
 0x102   :  { %v882_v24 = vpop.f32.mrf.mxu0  ;;  %v5339_v58 = vpop.f32.mrf.mxu1 }
 0x103   :  { %4261 = vmatprep.mubr.msk.bf16.mxu1 %vm1525_vm3, %v1435_v57  ;;  %v1321_v48 = vmax.f32 %v882_v24, 0.0 }
 0x104   :  { %v4130_v47 = vpop.f32.mrf.mxu0  ;;  %4262 = vmatmul.mubr.msk.bf16.gmra.mxu1 %vm1525_vm3, %v1436_v17  ;;  %v5341_v9 = vpop.f32.mrf.mxu1 }
 0x105   :  { %v1324_v39 = vmax.f32 %v4130_v47, 0.0 }
 0x106   :  { %v885_v40 = vpop.f32.mrf.mxu0  ;;  %v5349_v43 = vpop.f32.mrf.mxu1 }
 0x107   :  { %v1322_v55 = vmax.f32 %v885_v40, 0.0  ;;  %v1438_v11 = vpack.c.bf16 %v1324_v39, %v1323_v54 }
 0x108   :  { %v4133_v56 = vpop.f32.mrf.mxu0  ;;  %v5351_v13 = vpop.f32.mrf.mxu1 }
 0x109   :  { %v1437_v18 = vpack.c.bf16 %v1322_v55, %v1321_v48  ;;  %v1327_v28 = vmax.f32 %v4133_v56, 0.0 }
 0x10a   :  { %v898_v20 = vpop.f32.mrf.mxu0  ;;  %v5357_v59 = vpop.f32.mrf.mxu1 }
 0x10b   :  { %4265 = vmatprep.mubr.msk.bf16.mxu1 %vm1525_vm3, %v1437_v18  ;;  %v1325_v14 = vmax.f32 %v898_v20, 0.0 }
 0x10c   :  { %v4134_v63 = vpop.f32.mrf.mxu0  ;;  %4266 = vmatmul.mubr.msk.bf16.gmra.mxu1 %vm1525_vm3, %v1438_v11  ;;  %v5359_v48 = vpop.f32.mrf.mxu1 }
 0x10d   :  { %v1328_v50 = vmax.f32 %v4134_v63, 0.0 }
 0x10e   :  { %v901_v27 = vpop.f32.mrf.mxu0  ;;  %v5367_v21 = vpop.f32.mrf.mxu1 }
 0x10f   :  { %v1326_v3 = vmax.f32 %v901_v27, 0.0  ;;  %v1440_v5 = vpack.c.bf16 %v1328_v50, %v1327_v28 }
 0x110   :  { %v4137_v6 = vpop.f32.mrf.mxu0  ;;  %v5369_v56 = vpop.f32.mrf.mxu1 }
 0x111   :  { %v1439_v33 = vpack.c.bf16 %v1326_v3, %v1325_v14  ;;  %v1331_v44 = vmax.f32 %v4137_v6, 0.0  ;;  %v6217_v14 = vld [vmem:[#allocation3_spill] sm:$0xff]  ;;  %v6218_v3 = vld [vmem:[#allocation4_spill] sm:$0xff] }
 0x112   :  { %v914_v25 = vpop.f32.mrf.mxu0  ;;  %v5375_v27 = vpop.f32.mrf.mxu1  ;;  %2574 = vrot.lane.b32.xlu0 %v6217_v14, %s4593_s24  ;;  %2576 = vrot.lane.b32.xlu1 %v6218_v3, %s4593_s24 }
 0x113   :  { %4269 = vmatprep.mubr.msk.bf16.mxu1 %vm1525_vm3, %v1439_v33  ;;  %v1329_v57 = vmax.f32 %v914_v25, 0.0 }
 0x114   :  { %v4138_v29 = vpop.f32.mrf.mxu0  ;;  %4270 = vmatmul.mubr.msk.bf16.gmra.mxu1 %vm1525_vm3, %v1440_v5  ;;  %v5383_v33 = vpop.f32.mrf.mxu1  ;;  %v6219_v5 = vld [vmem:[#allocation5_spill] sm:$0xff] }
 0x115   :  { %v1332_v12 = vmax.f32 %v4138_v29, 0.0 }
 0x116   :  { %v917_v38 = vpop.f32.mrf.mxu0  ;;  %2578 = vrot.lane.b32.xlu0 %v6219_v5, %s4593_s24 }
 0x117   :  { %v1330_v17 = vmax.f32 %v917_v38, 0.0  ;;  %v1442_v39 = vpack.c.bf16 %v1332_v12, %v1331_v44  ;;  %v6220_v12 = vld [vmem:[#allocation6_spill] sm:$0xff] }
 0x118   :  { %v4141_v24 = vpop.f32.mrf.mxu0  ;;  %2580 = vrot.lane.b32.xlu1 %v6220_v12, %s4593_s24 }
 0x119   :  { %v1441_v47 = vpack.c.bf16 %v1330_v17, %v1329_v57  ;;  %v1335_v20 = vmax.f32 %v4141_v24, 0.0 }
 0x11a   :  { %v930_v40 = vpop.f32.mrf.mxu0 }
 0x11b   :  { %4273 = vmatprep.mubr.msk.bf16.mxu1 %vm1525_vm3, %v1441_v47  ;;  %v1333_v18 = vmax.f32 %v930_v40, 0.0  ;;  %v5389_v47 = vpop.f32.mrf.mxu1 }
 0x11c   :  { %v4142_v60 = vpop.f32.mrf.mxu0  ;;  %4274 = vmatmul.mubr.msk.bf16.gmra.mxu1 %vm1525_vm3, %v1442_v39  ;;  %v6221_v39 = vld [vmem:[#allocation7_spill] sm:$0xff]  ;;  %2584 = vrot.lane.b32.xlu1 %v5154_v15, %s4593_s24 }
 0x11d   :  { %v1336_v55 = vmax.f32 %v4142_v60, 0.0  ;;  %2582 = vrot.lane.b32.xlu0 %v6221_v39, %s4593_s24 }
 0x11e   :  { %v933_v54 = vpop.f32.mrf.mxu0 }
 0x11f   :  { %v1334_v11 = vmax.f32 %v933_v54, 0.0  ;;  %v1444_v26 = vpack.c.bf16 %v1336_v55, %v1335_v20  ;;  %v5397_v54 = vpop.f32.mrf.mxu1 }
 0x120   :  { %v4145_v63 = vpop.f32.mrf.mxu0 }
 0x121   :  { %v1443_v42 = vpack.c.bf16 %v1334_v11, %v1333_v18  ;;  %v1339_v38 = vmax.f32 %v4145_v63, 0.0 }
 0x122   :  { %v946_v50 = vpop.f32.mrf.mxu0 }
 0x123   :  { %4277 = vmatprep.mubr.msk.bf16.mxu1 %vm1525_vm3, %v1443_v42  ;;  %v1337_v25 = vmax.f32 %v946_v50, 0.0  ;;  %v5399_v50 = vpop.f32.mrf.mxu1 }
 0x124   :  { %v4146_v51 = vpop.f32.mrf.mxu0  ;;  %4278 = vmatmul.mubr.msk.bf16.gmra.mxu1 %vm1525_vm3, %v1444_v26 }
 0x125   :  { %v1340_v28 = vmax.f32 %v4146_v51, 0.0  ;;  %v5403_v51 = vpop.f32.mrf.mxu1 }
 0x126   :  { %v949_v6 = vpop.f32.mrf.mxu0 }
 0x127   :  { %v1338_v29 = vmax.f32 %v949_v6, 0.0  ;;  %v1446_v44 = vpack.c.bf16 %v1340_v28, %v1339_v38 }
 0x128   :  { %v4149_v57 = vpop.f32.mrf.mxu0 }
 0x129   :  { %v1445_v17 = vpack.c.bf16 %v1338_v29, %v1337_v25  ;;  %v1343_v22 = vmax.f32 %v4149_v57, 0.0  ;;  %v5405_v57 = vpop.f32.mrf.mxu1 }
 0x12a   :  { %v962_v24 = vpop.f32.mrf.mxu0 }
 0x12b   :  { %4281 = vmatprep.mubr.msk.bf16.mxu1 %vm1525_vm3, %v1445_v17  ;;  %v1341_v18 = vmax.f32 %v962_v24, 0.0  ;;  %v5409_v39 = vpop.f32.mrf.mxu1 }
 0x12c   :  { %v4150_v40 = vpop.f32.mrf.mxu0  ;;  %4282 = vmatmul.mubr.msk.bf16.gmra.mxu1 %vm1525_vm3, %v1446_v44 }
 0x12d   :  { %v1344_v60 = vmax.f32 %v4150_v40, 0.0 }
 0x12e   :  { %v965_v55 = vpop.f32.mrf.mxu0 }
 0x12f   :  { %v1342_v11 = vmax.f32 %v965_v55, 0.0  ;;  %v1448_v42 = vpack.c.bf16 %v1344_v60, %v1343_v22 }
 0x130   :  { %v4153_v20 = vpop.f32.mrf.mxu0 }
 0x131   :  { %v1447_v63 = vpack.c.bf16 %v1342_v11, %v1341_v18  ;;  %v1347_v5 = vmax.f32 %v4153_v20, 0.0 }
 0x132   :  { %v978_v26 = vpop.f32.mrf.mxu0 }
 0x133   :  { %4285 = vmatprep.mubr.msk.bf16.mxu1 %vm1525_vm3, %v1447_v63  ;;  %v1345_v28 = vmax.f32 %v978_v26, 0.0  ;;  %v5411_v63 = vpop.f32.mrf.mxu1 }
 0x134   :  { %v4154_v14 = vpop.f32.mrf.mxu0  ;;  %4286 = vmatmul.mubr.msk.bf16.gmra.mxu1 %vm1525_vm3, %v1448_v42 }
 0x135   :  { %v1348_v15 = vmax.f32 %v4154_v14, 0.0 }
 0x136   :  { %v981_v3 = vpop.f32.mrf.mxu0 }
 0x137   :  { %v1346_v6 = vmax.f32 %v981_v3, 0.0  ;;  %v1450_v12 = vpack.c.bf16 %v1348_v15, %v1347_v5  ;;  %v5415_v15 = vpop.f32.mrf.mxu1 }
 0x138   :  { %v4157_v25 = vpop.f32.mrf.mxu0 }
 0x139   :  { %v1449_v29 = vpack.c.bf16 %v1346_v6, %v1345_v28  ;;  %v1351_v55 = vmax.f32 %v4157_v25, 0.0 }
 0x13a   :  { %v994_v38 = vpop.f32.mrf.mxu0 }
 0x13b   :  { %4289 = vmatprep.mubr.msk.bf16.mxu1 %vm1525_vm3, %v1449_v29  ;;  %v1349_v40 = vmax.f32 %v994_v38, 0.0  ;;  %v5417_v38 = vpop.f32.mrf.mxu1 }
 0x13c   :  { %v4158_v17 = vpop.f32.mrf.mxu0  ;;  %4290 = vmatmul.mubr.msk.bf16.gmra.mxu1 %vm1525_vm3, %v1450_v12 }
 0x13d   :  { %v1352_v44 = vmax.f32 %v4158_v17, 0.0 }
 0x13e   :  { %v997_v24 = vpop.f32.mrf.mxu0 }
 0x13f   :  { %v1350_v60 = vmax.f32 %v997_v24, 0.0  ;;  %v1452_v22 = vpack.c.bf16 %v1352_v44, %v1351_v55  ;;  %v1362_v55 = vmax.f32 %v5235_v23, 0.0  ;;  %v1365_v23 = vmax.f32 %v5243_v52, 0.0 }
 0x140   :  { %v4161_v18 = vpop.f32.mrf.mxu0  ;;  %v1370_v52 = vmax.f32 %v5271_v19, 0.0 }
 0x141   :  { %v1451_v11 = vpack.c.bf16 %v1350_v60, %v1349_v40  ;;  %v1355_v6 = vmax.f32 %v4161_v18, 0.0  ;;  %v5421_v40 = vpop.f32.mrf.mxu1  ;;  %v1361_v60 = vmax.f32 %v5225_v49, 0.0  ;;  %v1364_v49 = vmax.f32 %v5227_v7, 0.0 }
 0x142   :  { %v1010_v20 = vpop.f32.mrf.mxu0  ;;  %v1369_v7 = vmax.f32 %v5261_v41, 0.0  ;;  %v1374_v41 = vmax.f32 %v5292_v36, 0.0 }
 0x143   :  { %4293 = vmatprep.mubr.msk.bf16.mxu1 %vm1525_vm3, %v1451_v11  ;;  %v1353_v3 = vmax.f32 %v1010_v20, 0.0 }
 0x144   :  { %v4162_v42 = vpop.f32.mrf.mxu0  ;;  %4294 = vmatmul.mubr.msk.bf16.gmra.mxu1 %vm1525_vm3, %v1452_v22 }
 0x145   :  { %v1356_v26 = vmax.f32 %v4162_v42, 0.0 }
 0x146   :  { %v1013_v14 = vpop.f32.mrf.mxu0 }
 0x147   :  { %v1354_v28 = vmax.f32 %v1013_v14, 0.0  ;;  %v1454_v29 = vpack.c.bf16 %v1356_v26, %v1355_v6  ;;  %v5425_v26 = vpop.f32.mrf.mxu1  ;;  %v1457_v14 = vpack.c.bf16 %v1362_v55, %v1361_v60  ;;  %v1366_v6 = vmax.f32 %v5253_v35, 0.0 }
 0x148   :  { %v4165_v5 = vpop.f32.mrf.mxu0  ;;  %v1371_v60 = vmax.f32 %v5255_v30, 0.0  ;;  %v1376_v30 = vmax.f32 %v5284_v2, 0.0  ;;  %v1381_v2 = vmax.f32 %v5318_v61, 0.0  ;;  %v1386_v61 = vmax.f32 %v5349_v43, 0.0 }
 0x149   :  { %v1453_v25 = vpack.c.bf16 %v1354_v28, %v1353_v3  ;;  %v1359_v22 = vmax.f32 %v4165_v5, 0.0  ;;  %v1363_v3 = vmax.f32 %v5219_v1, 0.0  ;;  %v5432_v28 = vpop.f32.mrf.mxu1  ;;  %v1368_v1 = vmax.f32 %v5245_v16, 0.0 }
 0x14a   :  { %v1026_v12 = vpop.f32.mrf.mxu0  ;;  %v1373_v16 = vmax.f32 %v5282_v32, 0.0  ;;  %v1378_v32 = vmax.f32 %v5310_v53, 0.0 }
 0x14b   :  { %4297 = vmatprep.mubr.msk.bf16.mxu1 %vm1525_vm3, %v1453_v25  ;;  %v1357_v18 = vmax.f32 %v1026_v12, 0.0  ;;  %v1458_v5 = vpack.c.bf16 %v1364_v49, %v1363_v3  ;;  %v5436_v25 = vpop.f32.mrf.mxu1  ;;  %v1367_v12 = vmax.f32 %v5237_v4, 0.0  ;;  %v1372_v4 = vmax.f32 %v5263_v0, 0.0 }
 0x14c   :  { %v4166_v17 = vpop.f32.mrf.mxu0  ;;  %4298 = vmatmul.mubr.msk.bf16.gmra.mxu1 %vm1525_vm3, %v1454_v29  ;;  %v1459_v29 = vpack.c.bf16 %v1366_v6, %v1365_v23  ;;  %v1377_v0 = vmax.f32 %v5300_v45, 0.0  ;;  %v1379_v3 = vmax.f32 %v5294_v8, 0.0  ;;  %v1382_v45 = vmax.f32 %v5328_v10, 0.0 }
 0x14d   :  { %v1360_v44 = vmax.f32 %v4166_v17, 0.0  ;;  %v5442_v17 = vpop.f32.mrf.mxu1  ;;  %v1384_v8 = vmax.f32 %v5320_v31, 0.0  ;;  %v1389_v31 = vmax.f32 %v5357_v59, 0.0  ;;  %v1394_v59 = vmax.f32 %v5389_v47, 0.0 }
 0x14e   :  { %v1029_v24 = vpop.f32.mrf.mxu0  ;;  %v1467_v6 = vpack.c.bf16 %v1382_v45, %v1381_v2 }
 0x14f   :  { %v1358_v11 = vmax.f32 %v1029_v24, 0.0  ;;  %v1456_v42 = vpack.c.bf16 %v1360_v44, %v1359_v22  ;;  %v1460_v44 = vpack.c.bf16 %v1368_v1, %v1367_v12  ;;  %v5446_v35 = vpop.f32.mrf.mxu1  ;;  %v1461_v24 = vpack.c.bf16 %v1370_v52, %v1369_v7 }
 0x150   :  { %v1375_v22 = vmax.f32 %v5276_v34, 0.0  ;;  %v1380_v34 = vmax.f32 %v5302_v37, 0.0  ;;  %v1385_v37 = vmax.f32 %v5339_v58, 0.0  ;;  %v1387_v7 = vmax.f32 %v5333_v62, 0.0 }
 0x151   :  { %v1455_v20 = vpack.c.bf16 %v1358_v11, %v1357_v18  ;;  %v5452_v55 = vpop.f32.mrf.mxu1  ;;  %v1462_v18 = vpack.c.bf16 %v1372_v4, %v1371_v60  ;;  %v1463_v11 = vpack.c.bf16 %v1374_v41, %v1373_v16  ;;  %v1390_v58 = vmax.f32 %v5367_v21, 0.0 }
 0x152   :  { %v1466_v23 = vpack.c.bf16 %v1380_v34, %v1379_v3  ;;  %v1469_v1 = vpack.c.bf16 %v1386_v61, %v1385_v37  ;;  %v1391_v60 = vmax.f32 %v5351_v13, 0.0  ;;  %v1392_v62 = vmax.f32 %v5359_v48, 0.0 }
 0x153   :  { %4301 = vmatprep.mubr.msk.bf16.mxu1 %vm1525_vm3, %v1455_v20  ;;  %v5456_v19 = vpop.f32.mrf.mxu1  ;;  %v1396_v13 = vmax.f32 %v5383_v33, 0.0  ;;  %v1397_v48 = vmax.f32 %v5399_v50, 0.0  ;;  %v1402_v50 = vmax.f32 %v5417_v38, 0.0  ;;  %v1404_v38 = vmax.f32 %v5415_v15, 0.0 }
 0x154   :  { %4302 = vmatmul.mubr.msk.bf16.gmra.mxu1 %vm1525_vm3, %v1456_v42  ;;  %v1464_v42 = vpack.c.bf16 %v1376_v30, %v1375_v22  ;;  %v1472_v16 = vpack.c.bf16 %v1392_v62, %v1391_v60 }
 0x155   :  { %4305 = vmatprep.mubr.msk.bf16.mxu1 %vm1525_vm3, %v1457_v14  ;;  %v5462_v20 = vpop.f32.mrf.mxu1  ;;  %v1465_v14 = vpack.c.bf16 %v1378_v32, %v1377_v0  ;;  %v1399_v32 = vmax.f32 %v5397_v54, 0.0 }
 0x157   :  { %v5466_v36 = vpop.f32.mrf.mxu1 }
 0x159   :  { %v5472_v49 = vpop.f32.mrf.mxu1 }
 0x15b   :  { %v5476_v53 = vpop.f32.mrf.mxu1 }
 0x15c   :  { %4306 = vmatmul.mubr.msk.bf16.gmra.mxu1 %vm1525_vm3, %v1458_v5  ;;  %v1383_v5 = vmax.f32 %v5312_v46, 0.0  ;;  %v1388_v46 = vmax.f32 %v5341_v9, 0.0  ;;  %v1393_v9 = vmax.f32 %v5375_v27, 0.0  ;;  %v1398_v27 = vmax.f32 %v5405_v57, 0.0 }
 0x15d   :  { %4309 = vmatprep.mubr.msk.bf16.mxu1 %vm1525_vm3, %v1459_v29  ;;  %v5482_v29 = vpop.f32.mrf.mxu1 }
 0x15e   :  { %v1468_v12 = vpack.c.bf16 %v1384_v8, %v1383_v5  ;;  %v1473_v41 = vpack.c.bf16 %v1394_v59, %v1393_v9  ;;  %v1475_v30 = vpack.c.bf16 %v1398_v27, %v1397_v48  ;;  %v1409_v48 = vmax.f32 %v5446_v35, 0.0 }
 0x15f   :  { %v5486_v10 = vpop.f32.mrf.mxu1  ;;  %v1410_v27 = vmax.f32 %v5456_v19, 0.0 }
 0x161   :  { %v5492_v52 = vpop.f32.mrf.mxu1 }
 0x163   :  { %v5496_v43 = vpop.f32.mrf.mxu1 }
 0x164   :  { %4310 = vmatmul.mubr.msk.bf16.gmra.mxu1 %vm1525_vm3, %v1460_v44  ;;  %v1470_v44 = vpack.c.bf16 %v1388_v46, %v1387_v7  ;;  %v2463_v7 = vpop.permute.xlu1 %2462 }
 0x165   :  { %4313 = vmatprep.mubr.msk.bf16.mxu1 %vm1525_vm3, %v1461_v24  ;;  %v1471_v24 = vpack.c.bf16 %v1390_v58, %v1389_v31  ;;  %v5502_v4 = vpop.f32.mrf.mxu1 }
 0x167   :  { %v5506_v21 = vpop.f32.mrf.mxu1 }
 0x16c   :  { %4314 = vmatmul.mubr.msk.bf16.gmra.mxu1 %vm1525_vm3, %v1462_v18  ;;  %v1395_v18 = vmax.f32 %v5369_v56, 0.0  ;;  %v1400_v56 = vmax.f32 %v5403_v51, 0.0 }
 0x16d   :  { %4317 = vmatprep.mubr.msk.bf16.mxu1 %vm1525_vm3, %v1463_v11  ;;  %v5512_v11 = vpop.f32.mrf.mxu1 }
 0x16e   :  { %v1474_v22 = vpack.c.bf16 %v1396_v13, %v1395_v18  ;;  %v1476_v34 = vpack.c.bf16 %v1400_v56, %v1399_v32  ;;  %v1408_v18 = vmax.f32 %v5432_v28, 0.0 }
 0x16f   :  { %v5516_v47 = vpop.f32.mrf.mxu1 }
 0x174   :  { %4318 = vmatmul.mubr.msk.bf16.gmra.mxu1 %vm1525_vm3, %v1464_v42  ;;  %v1401_v42 = vmax.f32 %v5411_v63, 0.0  ;;  %v1403_v63 = vmax.f32 %v5409_v39, 0.0 }
 0x175   :  { %4321 = vmatprep.mubr.msk.bf16.mxu1 %vm1525_vm3, %v1465_v14  ;;  %v2459_v14 = vpop.permute.xlu0 %2458 }
 0x179   :  { %v2461_v51 = vpop.permute.xlu0 %2460 }
 0x17c   :  { %4322 = vmatmul.mubr.msk.bf16.gmra.mxu1 %vm1525_vm3, %v1466_v23  ;;  %v1477_v23 = vpack.c.bf16 %v1402_v50, %v1401_v42  ;;  %v1481_v42 = vpack.c.bf16 %v1410_v27, %v1409_v48  ;;  %v1420_v48 = vmax.f32 %v5492_v52, 0.0 }
 0x17d   :  { %4325 = vmatprep.mubr.msk.bf16.mxu1 %vm1525_vm3, %v1467_v6  ;;  %v2467_v19 = vpop.permute.xlu0 %2466 }
 0x184   :  { %4326 = vmatmul.mubr.msk.bf16.gmra.mxu1 %vm1525_vm3, %v1468_v12  ;;  %v1405_v12 = vmax.f32 %v5425_v26, 0.0 }
 0x185   :  { %4329 = vmatprep.mubr.msk.bf16.mxu1 %vm1525_vm3, %v1469_v1  ;;  %v1406_v1 = vmax.f32 %v5436_v25, 0.0 }
 0x187   :  { %v1479_v15 = vpack.c.bf16 %v1406_v1, %v1405_v12 }
 0x18c   :  { %4330 = vmatmul.mubr.msk.bf16.gmra.mxu1 %vm1525_vm3, %v1470_v44 }
 0x18d   :  { %4333 = vmatprep.mubr.msk.bf16.mxu1 %vm1525_vm3, %v1471_v24  ;;  %v1478_v24 = vpack.c.bf16 %v1404_v38, %v1403_v63 }
 0x194   :  { %4334 = vmatmul.mubr.msk.bf16.gmra.mxu1 %vm1525_vm3, %v1472_v16  ;;  %v2465_v16 = vpop.permute.xlu1 %2464 }
 0x195   :  { %4337 = vmatprep.mubr.msk.bf16.mxu1 %vm1525_vm3, %v1473_v41  ;;  %v1407_v41 = vmax.f32 %v5421_v40, 0.0 }
 0x197   :  { %v1480_v56 = vpack.c.bf16 %v1408_v18, %v1407_v41 }
 0x19c   :  { %v4243_v0 = vpop.f32.mrf.mxu1  ;;  %4338 = vmatmul.mubr.msk.bf16.gmra.mxu1 %vm1525_vm3, %v1474_v22 }
 0x19d   :  { %4341 = vmatprep.mubr.msk.bf16.mxu1 %vm1525_vm3, %v1475_v30  ;;  %v2268_v2 = vmax.f32 %v4243_v0, 0.0 }
 0x19e   :  { %v1755_v33 = vpop.f32.mrf.mxu1 }
 0x19f   :  { %v2266_v6 = vmax.f32 %v1755_v33, 0.0 }
 0x1a0   :  { %v4244_v57 = vpop.f32.mrf.mxu1 }
 0x1a1   :  { %v2269_v3 = vmax.f32 %v4244_v57, 0.0 }
 0x1a2   :  { %v1758_v45 = vpop.f32.mrf.mxu1 }
 0x1a3   :  { %v2267_v5 = vmax.f32 %v1758_v45, 0.0  ;;  %v2395_v8 = vpack.c.bf16 %v2269_v3, %v2268_v2  ;;  %v2469_v3 = vpop.permute.xlu1 %2468  ;;  %v1412_v2 = vmax.f32 %v5452_v55, 0.0 }
 0x1a4   :  { %v4247_v37 = vpop.f32.mrf.mxu1  ;;  %4342 = vmatmul.mubr.msk.bf16.gmra.mxu1 %vm1525_vm3, %v1476_v34  ;;  %v1411_v34 = vmax.f32 %v5442_v17, 0.0 }
 0x1a5   :  { %v2394_v54 = vpack.c.bf16 %v2267_v5, %v2266_v6  ;;  %4345 = vmatprep.mubr.msk.bf16.mxu1 %vm1525_vm3, %v1477_v23  ;;  %v2591_v31 = vsel %vm617_vm2, %v2395_v8, %v2461_v51  ;;  %v2272_v39 = vmax.f32 %v4247_v37, 0.0  ;;  %v1413_v23 = vmax.f32 %v5466_v36, 0.0 }
 0x1a6   :  { %v1771_v61 = vpop.f32.mrf.mxu1  ;;  %v1414_v6 = vmax.f32 %v5476_v53, 0.0  ;;  %v1482_v51 = vpack.c.bf16 %v1412_v2, %v1411_v34  ;;  %v2471_v53 = vpop.permute.xlu0 %2470 }
 0x1a7   :  { %v2588_v46 = vsel %vm617_vm2, %v2394_v54, %v2459_v14  ;;  %v2270_v62 = vmax.f32 %v1771_v61, 0.0 }
 0x1a8   :  { %v4248_v58 = vpop.f32.mrf.mxu1  ;;  %4379 = vmatprep.mubr.msk.bf16.mxu0 %vm1525_vm3, %v2588_v46  ;;  %v1483_v38 = vpack.c.bf16 %v1414_v6, %v1413_v23  ;;  %v1415_v46 = vmax.f32 %v5462_v20, 0.0 }
 0x1a9   :  { %v2273_v44 = vmax.f32 %v4248_v58, 0.0  ;;  %4380 = vmatmul.mubr.msk.bf16.vlgmr.msra.gmra.mxu0 %vm1525_vm3, %v2591_v31  ;;  %v1416_v31 = vmax.f32 %v5472_v49, 0.0 }
 0x1aa   :  { %v1774_v60 = vpop.f32.mrf.mxu1 }
 0x1ab   :  { %v2271_v9 = vmax.f32 %v1774_v60, 0.0  ;;  %v2397_v26 = vpack.c.bf16 %v2273_v44, %v2272_v39  ;;  %v1417_v44 = vmax.f32 %v5486_v10, 0.0 }
 0x1ac   :  { %v4251_v59 = vpop.f32.mrf.mxu1  ;;  %4346 = vmatmul.mubr.msk.bf16.gmra.mxu1 %vm1525_vm3, %v1478_v24  ;;  %v1418_v24 = vmax.f32 %v5496_v43, 0.0  ;;  %v2475_v43 = vpop.permute.xlu0 %2474 }
 0x1ad   :  { %v2396_v25 = vpack.c.bf16 %v2271_v9, %v2270_v62  ;;  %4349 = vmatprep.mubr.msk.bf16.mxu1 %vm1525_vm3, %v1479_v15  ;;  %v2597_v30 = vsel %vm617_vm2, %v2397_v26, %v2465_v16  ;;  %v2276_v33 = vmax.f32 %v4251_v59, 0.0  ;;  %v1484_v9 = vpack.c.bf16 %v1416_v31, %v1415_v46 }
 0x1ae   :  { %v1787_v13 = vpop.f32.mrf.mxu1  ;;  %v1485_v59 = vpack.c.bf16 %v1418_v24, %v1417_v44 }
 0x1af   :  { %v2594_v22 = vsel %vm617_vm2, %v2396_v25, %v2463_v7  ;;  %v2274_v28 = vmax.f32 %v1787_v13, 0.0  ;;  %v2473_v7 = vpop.permute.xlu1 %2472  ;;  %v1419_v13 = vmax.f32 %v5482_v29, 0.0 }
 0x1b0   :  { %v4252_v0 = vpop.f32.mrf.mxu1  ;;  %4383 = vmatprep.mubr.msk.bf16.mxu0 %vm1525_vm3, %v2594_v22  ;;  %v1421_v22 = vmax.f32 %v5506_v21, 0.0 }
 0x1b1   :  { %v2277_v32 = vmax.f32 %v4252_v0, 0.0  ;;  %4384 = vmatmul.mubr.msk.bf16.gmra.mxu0 %vm1525_vm3, %v2597_v30  ;;  %v1422_v30 = vmax.f32 %v5516_v47, 0.0  ;;  %v2479_v47 = vpop.permute.xlu0 %2478 }
 0x1b2   :  { %v1790_v40 = vpop.f32.mrf.mxu1 }
 0x1b3   :  { %v2275_v50 = vmax.f32 %v1790_v40, 0.0  ;;  %v2399_v14 = vpack.c.bf16 %v2277_v32, %v2276_v33  ;;  %v2477_v18 = vpop.permute.xlu1 %2476  ;;  %v1486_v40 = vpack.c.bf16 %v1420_v48, %v1419_v13 }
 0x1b4   :  { %v4255_v35 = vpop.f32.mrf.mxu1  ;;  %4350 = vmatmul.mubr.msk.bf16.gmra.mxu1 %vm1525_vm3, %v1480_v56 }
 0x1b5   :  { %v2398_v57 = vpack.c.bf16 %v2275_v50, %v2274_v28  ;;  %4353 = vmatprep.mubr.msk.bf16.mxu1 %vm1525_vm3, %v1481_v42  ;;  %v2603_v8 = vsel %vm617_vm2, %v2399_v14, %v2469_v3  ;;  %v2280_v63 = vmax.f32 %v4255_v35, 0.0  ;;  %v1487_v28 = vpack.c.bf16 %v1422_v30, %v1421_v22 }
 0x1b6   :  { %v1803_v45 = vpop.f32.mrf.mxu1  ;;  %v1424_v3 = vmax.f32 %v5512_v11, 0.0  ;;  %v2483_v11 = vpop.permute.xlu0 %2482 }
 0x1b7   :  { %v2600_v5 = vsel %vm617_vm2, %v2398_v57, %v2467_v19  ;;  %v2278_v55 = vmax.f32 %v1803_v45, 0.0  ;;  %v2481_v19 = vpop.permute.xlu1 %2480  ;;  %v1423_v57 = vmax.f32 %v5502_v4, 0.0 }
 0x1b8   :  { %v4256_v37 = vpop.f32.mrf.mxu1  ;;  %4387 = vmatprep.mubr.msk.bf16.mxu0 %vm1525_vm3, %v2600_v5 }
 0x1b9   :  { %v2281_v54 = vmax.f32 %v4256_v37, 0.0  ;;  %4388 = vmatmul.mubr.msk.bf16.gmra.mxu0 %vm1525_vm3, %v2603_v8  ;;  %v1488_v5 = vpack.c.bf16 %v1424_v3, %v1423_v57 }
 0x1ba   :  { %v1806_v17 = vpop.f32.mrf.mxu1  ;;  %v2487_v24 = vpop.permute.xlu0 %2486 }
 0x1bb   :  { %v2279_v61 = vmax.f32 %v1806_v17, 0.0  ;;  %v2401_v12 = vpack.c.bf16 %v2281_v54, %v2280_v63 }
 0x1bc   :  { %v4259_v36 = vpop.f32.mrf.mxu1  ;;  %4354 = vmatmul.mubr.msk.bf16.gmra.mxu1 %vm1525_vm3, %v1482_v51 }
 0x1bd   :  { %v2400_v1 = vpack.c.bf16 %v2279_v61, %v2278_v55  ;;  %4357 = vmatprep.mubr.msk.bf16.mxu1 %vm1525_vm3, %v1483_v38  ;;  %v2609_v60 = vsel %vm617_vm2, %v2401_v12, %v2473_v7  ;;  %v2284_v26 = vmax.f32 %v4259_v36, 0.0  ;;  %v2485_v38 = vpop.permute.xlu1 %2484 }
 0x1be   :  { %v1819_v58 = vpop.f32.mrf.mxu1 }
 0x1bf   :  { %v2606_v39 = vsel %vm617_vm2, %v2400_v1, %v2471_v53  ;;  %v2282_v49 = vmax.f32 %v1819_v58, 0.0 }
 0x1c0   :  { %v4260_v15 = vpop.f32.mrf.mxu1  ;;  %4391 = vmatprep.mubr.msk.bf16.mxu0 %vm1525_vm3, %v2606_v39 }
 0x1c1   :  { %v2285_v62 = vmax.f32 %v4260_v15, 0.0  ;;  %4392 = vmatmul.mubr.msk.bf16.gmra.mxu0 %vm1525_vm3, %v2609_v60  ;;  %v2489_v60 = vpop.permute.xlu1 %2488 }
 0x1c2   :  { %v1822_v20 = vpop.f32.mrf.mxu1 }
 0x1c3   :  { %v2283_v25 = vmax.f32 %v1822_v20, 0.0  ;;  %v2403_v16 = vpack.c.bf16 %v2285_v62, %v2284_v26 }
 0x1c4   :  { %v4263_v10 = vpop.f32.mrf.mxu1  ;;  %4358 = vmatmul.mubr.msk.bf16.gmra.mxu1 %vm1525_vm3, %v1484_v9 }
 0x1c5   :  { %v2402_v41 = vpack.c.bf16 %v2283_v25, %v2282_v49  ;;  %4361 = vmatprep.mubr.msk.bf16.mxu1 %vm1525_vm3, %v1485_v59  ;;  %v2615_v32 = vsel %vm617_vm2, %v2403_v16, %v2477_v18  ;;  %v2288_v42 = vmax.f32 %v4263_v10, 0.0  ;;  %v2493_v13 = vpop.permute.xlu1 %2492 }
 0x1c6   :  { %v1835_v27 = vpop.f32.mrf.mxu1 }
 0x1c7   :  { %v2612_v0 = vsel %vm617_vm2, %v2402_v41, %v2475_v43  ;;  %v2286_v52 = vmax.f32 %v1835_v27, 0.0  ;;  %v2491_v41 = vpop.permute.xlu0 %2490 }
 0x1c8   :  { %v4264_v56 = vpop.f32.mrf.mxu1  ;;  %4395 = vmatprep.mubr.msk.bf16.mxu0 %vm1525_vm3, %v2612_v0 }
 0x1c9   :  { %v2289_v33 = vmax.f32 %v4264_v56, 0.0  ;;  %4396 = vmatmul.mubr.msk.bf16.gmra.mxu0 %vm1525_vm3, %v2615_v32 }
 0x1ca   :  { %v1838_v29 = vpop.f32.mrf.mxu1 }
 0x1cb   :  { %v2287_v50 = vmax.f32 %v1838_v29, 0.0  ;;  %v2405_v14 = vpack.c.bf16 %v2289_v33, %v2288_v42 }
 0x1cc   :  { %v4267_v21 = vpop.f32.mrf.mxu1  ;;  %4362 = vmatmul.mubr.msk.bf16.gmra.mxu1 %vm1525_vm3, %v1486_v40 }
 0x1cd   :  { %v2404_v35 = vpack.c.bf16 %v2287_v50, %v2286_v52  ;;  %4365 = vmatprep.mubr.msk.bf16.mxu1 %vm1525_vm3, %v1487_v28  ;;  %v2621_v45 = vsel %vm617_vm2, %v2405_v14, %v2481_v19  ;;  %v2292_v8 = vmax.f32 %v4267_v21, 0.0  ;;  %v2495_v28 = vpop.permute.xlu0 %2494  ;;  %v2497_v50 = vpop.permute.xlu1 %2496 }
 0x1ce   :  { %v1851_v34 = vpop.f32.mrf.mxu1 }
 0x1cf   :  { %v2618_v2 = vsel %vm617_vm2, %v2404_v35, %v2479_v47  ;;  %v2290_v54 = vmax.f32 %v1851_v34, 0.0 }
 0x1d0   :  { %v4268_v23 = vpop.f32.mrf.mxu1  ;;  %4399 = vmatprep.mubr.msk.bf16.mxu0 %vm1525_vm3, %v2618_v2 }
 0x1d1   :  { %v2293_v6 = vmax.f32 %v4268_v23, 0.0  ;;  %4400 = vmatmul.mubr.msk.bf16.gmra.mxu0 %vm1525_vm3, %v2621_v45 }
 0x1d2   :  { %v1854_v37 = vpop.f32.mrf.mxu1 }
 0x1d3   :  { %v2291_v51 = vmax.f32 %v1854_v37, 0.0  ;;  %v2407_v63 = vpack.c.bf16 %v2293_v6, %v2292_v8  ;;  %v2499_v6 = vpop.permute.xlu0 %2498  ;;  %v2501_v8 = vpop.permute.xlu1 %2500 }
 0x1d4   :  { %v4271_v4 = vpop.f32.mrf.mxu1  ;;  %4366 = vmatmul.mubr.msk.bf16.gmra.mxu1 %vm1525_vm3, %v1488_v5 }
 0x1d5   :  { %v2406_v17 = vpack.c.bf16 %v2291_v51, %v2290_v54  ;;  %v2627_v12 = vsel %vm617_vm2, %v2407_v63, %v2485_v38  ;;  %v2296_v1 = vmax.f32 %v4271_v4, 0.0 }
 0x1d6   :  { %v1867_v55 = vpop.f32.mrf.mxu1 }
 0x1d7   :  { %v2624_v61 = vsel %vm617_vm2, %v2406_v17, %v2483_v11  ;;  %v2294_v46 = vmax.f32 %v1867_v55, 0.0 }
 0x1d8   :  { %v4272_v36 = vpop.f32.mrf.mxu1  ;;  %4403 = vmatprep.mubr.msk.bf16.mxu0 %vm1525_vm3, %v2624_v61 }
 0x1d9   :  { %v2297_v53 = vmax.f32 %v4272_v36, 0.0  ;;  %4404 = vmatmul.mubr.msk.bf16.gmra.mxu0 %vm1525_vm3, %v2627_v12  ;;  %v2503_v36 = vpop.permute.xlu0 %2502 }
 0x1da   :  { %v1870_v7 = vpop.f32.mrf.mxu1 }
 0x1db   :  { %v2295_v31 = vmax.f32 %v1870_v7, 0.0  ;;  %v2409_v58 = vpack.c.bf16 %v2297_v53, %v2296_v1  ;;  %v2505_v1 = vpop.permute.xlu1 %2504 }
 0x1dc   :  { %v4275_v44 = vpop.f32.mrf.mxu1 }
 0x1dd   :  { %v2408_v39 = vpack.c.bf16 %v2295_v31, %v2294_v46  ;;  %v2633_v9 = vsel %vm617_vm2, %v2409_v58, %v2489_v60  ;;  %v2300_v59 = vmax.f32 %v4275_v44, 0.0 }
 0x1de   :  { %v1883_v15 = vpop.f32.mrf.mxu1 }
 0x1df   :  { %v2630_v62 = vsel %vm617_vm2, %v2408_v39, %v2487_v24  ;;  %v2298_v25 = vmax.f32 %v1883_v15, 0.0 }
 0x1e0   :  { %v4276_v26 = vpop.f32.mrf.mxu1  ;;  %4407 = vmatprep.mubr.msk.bf16.mxu0 %vm1525_vm3, %v2630_v62 }
 0x1e1   :  { %v2301_v20 = vmax.f32 %v4276_v26, 0.0  ;;  %4408 = vmatmul.mubr.msk.bf16.gmra.mxu0 %vm1525_vm3, %v2633_v9  ;;  %v2507_v26 = vpop.permute.xlu0 %2506 }
 0x1e2   :  { %v1886_v49 = vpop.f32.mrf.mxu1 }
 0x1e3   :  { %v2299_v16 = vmax.f32 %v1886_v49, 0.0  ;;  %v2411_v10 = vpack.c.bf16 %v2301_v20, %v2300_v59  ;;  %v2509_v59 = vpop.permute.xlu1 %2508 }
 0x1e4   :  { %v4279_v43 = vpop.f32.mrf.mxu1 }
 0x1e5   :  { %v2410_v18 = vpack.c.bf16 %v2299_v16, %v2298_v25  ;;  %v2639_v22 = vsel %vm617_vm2, %v2411_v10, %v2493_v13  ;;  %v2304_v32 = vmax.f32 %v4279_v43, 0.0 }
 0x1e6   :  { %v1899_v48 = vpop.f32.mrf.mxu1 }
 0x1e7   :  { %v2636_v27 = vsel %vm617_vm2, %v2410_v18, %v2491_v41  ;;  %v2302_v33 = vmax.f32 %v1899_v48, 0.0 }
 0x1e8   :  { %v4280_v30 = vpop.f32.mrf.mxu1  ;;  %4411 = vmatprep.mubr.msk.bf16.mxu0 %vm1525_vm3, %v2636_v27 }
 0x1e9   :  { %v2305_v0 = vmax.f32 %v4280_v30, 0.0  ;;  %4412 = vmatmul.mubr.msk.bf16.gmra.mxu0 %vm1525_vm3, %v2639_v22  ;;  %v2511_v30 = vpop.permute.xlu0 %2510 }
 0x1ea   :  { %v1902_v56 = vpop.f32.mrf.mxu1 }
 0x1eb   :  { %v2303_v40 = vmax.f32 %v1902_v56, 0.0  ;;  %v2413_v42 = vpack.c.bf16 %v2305_v0, %v2304_v32  ;;  %v2513_v32 = vpop.permute.xlu1 %2512 }
 0x1ec   :  { %v4283_v29 = vpop.f32.mrf.mxu1 }
 0x1ed   :  { %v2412_v52 = vpack.c.bf16 %v2303_v40, %v2302_v33  ;;  %v2645_v47 = vsel %vm617_vm2, %v2413_v42, %v2497_v50  ;;  %v2308_v57 = vmax.f32 %v4283_v29, 0.0 }
 0x1ee   :  { %v1915_v14 = vpop.f32.mrf.mxu1 }
 0x1ef   :  { %v2642_v21 = vsel %vm617_vm2, %v2412_v52, %v2495_v28  ;;  %v2306_v34 = vmax.f32 %v1915_v14, 0.0 }
 0x1f0   :  { %v4284_v35 = vpop.f32.mrf.mxu1  ;;  %4415 = vmatprep.mubr.msk.bf16.mxu0 %vm1525_vm3, %v2642_v21 }
 0x1f1   :  { %v2309_v19 = vmax.f32 %v4284_v35, 0.0  ;;  %4416 = vmatmul.mubr.msk.bf16.gmra.mxu0 %vm1525_vm3, %v2645_v47  ;;  %v2515_v35 = vpop.permute.xlu0 %2514 }
 0x1f2   :  { %v1918_v3 = vpop.f32.mrf.mxu1 }
 0x1f3   :  { %v2307_v2 = vmax.f32 %v1918_v3, 0.0  ;;  %v2415_v45 = vpack.c.bf16 %v2309_v19, %v2308_v57  ;;  %v2517_v57 = vpop.permute.xlu1 %2516 }
 0x1f4   :  { %v4287_v23 = vpop.f32.mrf.mxu1 }
 0x1f5   :  { %v2414_v5 = vpack.c.bf16 %v2307_v2, %v2306_v34  ;;  %v2651_v51 = vsel %vm617_vm2, %v2415_v45, %v2501_v8  ;;  %v2312_v11 = vmax.f32 %v4287_v23, 0.0 }
 0x1f6   :  { %v1931_v37 = vpop.f32.mrf.mxu1 }
 0x1f7   :  { %v2648_v54 = vsel %vm617_vm2, %v2414_v5, %v2499_v6  ;;  %v2310_v38 = vmax.f32 %v1931_v37, 0.0 }
 0x1f8   :  { %v4288_v63 = vpop.f32.mrf.mxu1  ;;  %4419 = vmatprep.mubr.msk.bf16.mxu0 %vm1525_vm3, %v2648_v54 }
 0x1f9   :  { %v2313_v4 = vmax.f32 %v4288_v63, 0.0  ;;  %4420 = vmatmul.mubr.msk.bf16.gmra.mxu0 %vm1525_vm3, %v2651_v51  ;;  %v2519_v63 = vpop.permute.xlu0 %2518 }
 0x1fa   :  { %v1934_v17 = vpop.f32.mrf.mxu1 }
 0x1fb   :  { %v2311_v55 = vmax.f32 %v1934_v17, 0.0  ;;  %v2417_v61 = vpack.c.bf16 %v2313_v4, %v2312_v11  ;;  %v2521_v11 = vpop.permute.xlu1 %2520 }
 0x1fc   :  { %v4291_v12 = vpop.f32.mrf.mxu1 }
 0x1fd   :  { %v2416_v53 = vpack.c.bf16 %v2311_v55, %v2310_v38  ;;  %v2657_v31 = vsel %vm617_vm2, %v2417_v61, %v2505_v1  ;;  %v2316_v24 = vmax.f32 %v4291_v12, 0.0 }
 0x1fe   :  { %v1947_v7 = vpop.f32.mrf.mxu1 }
 0x1ff   :  { %v2654_v46 = vsel %vm617_vm2, %v2416_v53, %v2503_v36  ;;  %v2314_v60 = vmax.f32 %v1947_v7, 0.0 }
 0x200   :  { %v4292_v58 = vpop.f32.mrf.mxu1  ;;  %4423 = vmatprep.mubr.msk.bf16.mxu0 %vm1525_vm3, %v2654_v46 }
 0x201   :  { %v2317_v44 = vmax.f32 %v4292_v58, 0.0  ;;  %4424 = vmatmul.mubr.msk.bf16.gmra.mxu0 %vm1525_vm3, %v2657_v31  ;;  %v2523_v58 = vpop.permute.xlu0 %2522 }
 0x202   :  { %v1950_v39 = vpop.f32.mrf.mxu1 }
 0x203   :  { %v2315_v15 = vmax.f32 %v1950_v39, 0.0  ;;  %v2419_v62 = vpack.c.bf16 %v2317_v44, %v2316_v24  ;;  %v2525_v24 = vpop.permute.xlu1 %2524 }
 0x204   :  { %v4295_v9 = vpop.f32.mrf.mxu1 }
 0x205   :  { %v2418_v20 = vpack.c.bf16 %v2315_v15, %v2314_v60  ;;  %v2663_v16 = vsel %vm617_vm2, %v2419_v62, %v2509_v59  ;;  %v2320_v41 = vmax.f32 %v4295_v9, 0.0 }
 0x206   :  { %v1963_v49 = vpop.f32.mrf.mxu1 }
 0x207   :  { %v2660_v25 = vsel %vm617_vm2, %v2418_v20, %v2507_v26  ;;  %v2318_v13 = vmax.f32 %v1963_v49, 0.0 }
 0x208   :  { %v4296_v10 = vpop.f32.mrf.mxu1  ;;  %4427 = vmatprep.mubr.msk.bf16.mxu0 %vm1525_vm3, %v2660_v25 }
 0x209   :  { %v2321_v43 = vmax.f32 %v4296_v10, 0.0  ;;  %4428 = vmatmul.mubr.msk.bf16.gmra.mxu0 %vm1525_vm3, %v2663_v16  ;;  %v2527_v10 = vpop.permute.xlu0 %2526 }
 0x20a   :  { %v1966_v18 = vpop.f32.mrf.mxu1 }
 0x20b   :  { %v2319_v48 = vmax.f32 %v1966_v18, 0.0  ;;  %v2421_v27 = vpack.c.bf16 %v2321_v43, %v2320_v41  ;;  %v2529_v41 = vpop.permute.xlu1 %2528 }
 0x20c   :  { %v4299_v22 = vpop.f32.mrf.mxu1 }
 0x20d   :  { %v2420_v0 = vpack.c.bf16 %v2319_v48, %v2318_v13  ;;  %v2669_v40 = vsel %vm617_vm2, %v2421_v27, %v2513_v32  ;;  %v2324_v28 = vmax.f32 %v4299_v22, 0.0 }
 0x20e   :  { %v1979_v56 = vpop.f32.mrf.mxu1 }
 0x20f   :  { %v2666_v33 = vsel %vm617_vm2, %v2420_v0, %v2511_v30  ;;  %v2322_v50 = vmax.f32 %v1979_v56, 0.0 }
 0x210   :  { %v4300_v42 = vpop.f32.mrf.mxu1  ;;  %4431 = vmatprep.mubr.msk.bf16.mxu0 %vm1525_vm3, %v2666_v33 }
 0x211   :  { %v2325_v29 = vmax.f32 %v4300_v42, 0.0  ;;  %4432 = vmatmul.mubr.msk.bf16.gmra.mxu0 %vm1525_vm3, %v2669_v40  ;;  %v2531_v42 = vpop.permute.xlu0 %2530 }
 0x212   :  { %v1982_v52 = vpop.f32.mrf.mxu1 }
 0x213   :  { %v2323_v14 = vmax.f32 %v1982_v52, 0.0  ;;  %v2423_v21 = vpack.c.bf16 %v2325_v29, %v2324_v28  ;;  %v2533_v28 = vpop.permute.xlu1 %2532 }
 0x214   :  { %v4303_v47 = vpop.f32.mrf.mxu1 }
 0x215   :  { %v2422_v19 = vpack.c.bf16 %v2323_v14, %v2322_v50  ;;  %v2675_v2 = vsel %vm617_vm2, %v2423_v21, %v2517_v57  ;;  %v2328_v6 = vmax.f32 %v4303_v47, 0.0 }
 0x216   :  { %v1995_v3 = vpop.f32.mrf.mxu1 }
 0x217   :  { %v2672_v34 = vsel %vm617_vm2, %v2422_v19, %v2515_v35  ;;  %v2326_v8 = vmax.f32 %v1995_v3, 0.0 }
 0x218   :  { %v4304_v45 = vpop.f32.mrf.mxu1  ;;  %4435 = vmatprep.mubr.msk.bf16.mxu0 %vm1525_vm3, %v2672_v34 }
 0x219   :  { %v2329_v23 = vmax.f32 %v4304_v45, 0.0  ;;  %4436 = vmatmul.mubr.msk.bf16.gmra.mxu0 %vm1525_vm3, %v2675_v2  ;;  %v2535_v45 = vpop.permute.xlu0 %2534 }
 0x21a   :  { %v1998_v5 = vpop.f32.mrf.mxu1 }
 0x21b   :  { %v2327_v37 = vmax.f32 %v1998_v5, 0.0  ;;  %v2425_v54 = vpack.c.bf16 %v2329_v23, %v2328_v6  ;;  %v2537_v6 = vpop.permute.xlu1 %2536 }
 0x21c   :  { %v4307_v51 = vpop.f32.mrf.mxu1 }
 0x21d   :  { %v2424_v4 = vpack.c.bf16 %v2327_v37, %v2326_v8  ;;  %v2681_v55 = vsel %vm617_vm2, %v2425_v54, %v2521_v11  ;;  %v2332_v36 = vmax.f32 %v4307_v51, 0.0 }
 0x21e   :  { %v2011_v17 = vpop.f32.mrf.mxu1 }
 0x21f   :  { %v2678_v38 = vsel %vm617_vm2, %v2424_v4, %v2519_v63  ;;  %v2330_v1 = vmax.f32 %v2011_v17, 0.0 }
 0x220   :  { %v4308_v61 = vpop.f32.mrf.mxu1  ;;  %4439 = vmatprep.mubr.msk.bf16.mxu0 %vm1525_vm3, %v2678_v38 }
 0x221   :  { %v2333_v12 = vmax.f32 %v4308_v61, 0.0  ;;  %4440 = vmatmul.mubr.msk.bf16.gmra.mxu0 %vm1525_vm3, %v2681_v55  ;;  %v2539_v61 = vpop.permute.xlu0 %2538 }
 0x222   :  { %v2014_v53 = vpop.f32.mrf.mxu1 }
 0x223   :  { %v2331_v7 = vmax.f32 %v2014_v53, 0.0  ;;  %v2427_v46 = vpack.c.bf16 %v2333_v12, %v2332_v36  ;;  %v2541_v36 = vpop.permute.xlu1 %2540 }
 0x224   :  { %v4311_v31 = vpop.f32.mrf.mxu1 }
 0x225   :  { %v2426_v44 = vpack.c.bf16 %v2331_v7, %v2330_v1  ;;  %v2687_v15 = vsel %vm617_vm2, %v2427_v46, %v2525_v24  ;;  %v2336_v26 = vmax.f32 %v4311_v31, 0.0 }
 0x226   :  { %v2027_v39 = vpop.f32.mrf.mxu1 }
 0x227   :  { %v2684_v60 = vsel %vm617_vm2, %v2426_v44, %v2523_v58  ;;  %v2334_v59 = vmax.f32 %v2027_v39, 0.0 }
 0x228   :  { %v4312_v62 = vpop.f32.mrf.mxu1  ;;  %4443 = vmatprep.mubr.msk.bf16.mxu0 %vm1525_vm3, %v2684_v60 }
 0x229   :  { %v2337_v9 = vmax.f32 %v4312_v62, 0.0  ;;  %4444 = vmatmul.mubr.msk.bf16.gmra.mxu0 %vm1525_vm3, %v2687_v15  ;;  %v2543_v62 = vpop.permute.xlu0 %2542 }
 0x22a   :  { %v2030_v20 = vpop.f32.mrf.mxu1 }
 0x22b   :  { %v2335_v49 = vmax.f32 %v2030_v20, 0.0  ;;  %v2429_v25 = vpack.c.bf16 %v2337_v9, %v2336_v26  ;;  %v2545_v26 = vpop.permute.xlu1 %2544 }
 0x22c   :  { %v4315_v16 = vpop.f32.mrf.mxu1 }
 0x22d   :  { %v2428_v43 = vpack.c.bf16 %v2335_v49, %v2334_v59  ;;  %v2693_v48 = vsel %vm617_vm2, %v2429_v25, %v2529_v41  ;;  %v2340_v30 = vmax.f32 %v4315_v16, 0.0 }
 0x22e   :  { %v2043_v18 = vpop.f32.mrf.mxu1 }
 0x22f   :  { %v2690_v13 = vsel %vm617_vm2, %v2428_v43, %v2527_v10  ;;  %v2338_v32 = vmax.f32 %v2043_v18, 0.0 }
 0x230   :  { %v4316_v27 = vpop.f32.mrf.mxu1  ;;  %4447 = vmatprep.mubr.msk.bf16.mxu0 %vm1525_vm3, %v2690_v13 }
 0x231   :  { %v2341_v22 = vmax.f32 %v4316_v27, 0.0  ;;  %4448 = vmatmul.mubr.msk.bf16.gmra.mxu0 %vm1525_vm3, %v2693_v48  ;;  %v2547_v27 = vpop.permute.xlu0 %2546 }
 0x232   :  { %v2046_v0 = vpop.f32.mrf.mxu1 }
 0x233   :  { %v2339_v56 = vmax.f32 %v2046_v0, 0.0  ;;  %v2431_v33 = vpack.c.bf16 %v2341_v22, %v2340_v30  ;;  %v2549_v30 = vpop.permute.xlu1 %2548 }
 0x234   :  { %v4319_v40 = vpop.f32.mrf.mxu1 }
 0x235   :  { %v2430_v29 = vpack.c.bf16 %v2339_v56, %v2338_v32  ;;  %v2699_v14 = vsel %vm617_vm2, %v2431_v33, %v2533_v28  ;;  %v2344_v35 = vmax.f32 %v4319_v40, 0.0 }
 0x236   :  { %v2059_v52 = vpop.f32.mrf.mxu1 }
 0x237   :  { %v2696_v50 = vsel %vm617_vm2, %v2430_v29, %v2531_v42  ;;  %v2342_v57 = vmax.f32 %v2059_v52, 0.0 }
 0x238   :  { %v4320_v21 = vpop.f32.mrf.mxu1  ;;  %4451 = vmatprep.mubr.msk.bf16.mxu0 %vm1525_vm3, %v2696_v50 }
 0x239   :  { %v2345_v47 = vmax.f32 %v4320_v21, 0.0  ;;  %4452 = vmatmul.mubr.msk.bf16.gmra.mxu0 %vm1525_vm3, %v2699_v14  ;;  %v2551_v21 = vpop.permute.xlu0 %2550 }
 0x23a   :  { %v2062_v19 = vpop.f32.mrf.mxu1 }
 0x23b   :  { %v2343_v3 = vmax.f32 %v2062_v19, 0.0  ;;  %v2433_v34 = vpack.c.bf16 %v2345_v47, %v2344_v35  ;;  %v2553_v35 = vpop.permute.xlu1 %2552 }
 0x23c   :  { %v4323_v2 = vpop.f32.mrf.mxu1 }
 0x23d   :  { %v2432_v23 = vpack.c.bf16 %v2343_v3, %v2342_v57  ;;  %v2705_v37 = vsel %vm617_vm2, %v2433_v34, %v2537_v6  ;;  %v2348_v63 = vmax.f32 %v4323_v2, 0.0 }
 0x23e   :  { %v2075_v5 = vpop.f32.mrf.mxu1 }
 0x23f   :  { %v2702_v8 = vsel %vm617_vm2, %v2432_v23, %v2535_v45  ;;  %v2346_v11 = vmax.f32 %v2075_v5, 0.0 }
 0x240   :  { %v4324_v54 = vpop.f32.mrf.mxu1  ;;  %4455 = vmatprep.mubr.msk.bf16.mxu0 %vm1525_vm3, %v2702_v8 }
 0x241   :  { %v2349_v51 = vmax.f32 %v4324_v54, 0.0  ;;  %4456 = vmatmul.mubr.msk.bf16.gmra.mxu0 %vm1525_vm3, %v2705_v37  ;;  %v2555_v54 = vpop.permute.xlu0 %2554 }
 0x242   :  { %v2078_v4 = vpop.f32.mrf.mxu1 }
 0x243   :  { %v2347_v17 = vmax.f32 %v2078_v4, 0.0  ;;  %v2435_v38 = vpack.c.bf16 %v2349_v51, %v2348_v63  ;;  %v2557_v63 = vpop.permute.xlu1 %2556 }
 0x244   :  { %v4327_v55 = vpop.f32.mrf.mxu1 }
 0x245   :  { %v2434_v12 = vpack.c.bf16 %v2347_v17, %v2346_v11  ;;  %v2711_v7 = vsel %vm617_vm2, %v2435_v38, %v2541_v36  ;;  %v2352_v58 = vmax.f32 %v4327_v55, 0.0 }
 0x246   :  { %v2091_v53 = vpop.f32.mrf.mxu1 }
 0x247   :  { %v2708_v1 = vsel %vm617_vm2, %v2434_v12, %v2539_v61  ;;  %v2350_v24 = vmax.f32 %v2091_v53, 0.0 }
 0x248   :  { %v4328_v46 = vpop.f32.mrf.mxu1  ;;  %4459 = vmatprep.mubr.msk.bf16.mxu0 %vm1525_vm3, %v2708_v1 }
 0x249   :  { %v2353_v31 = vmax.f32 %v4328_v46, 0.0  ;;  %4460 = vmatmul.mubr.msk.bf16.gmra.mxu0 %vm1525_vm3, %v2711_v7 }
 0x24a   :  { %v2094_v44 = vpop.f32.mrf.mxu1 }
 0x24b   :  { %v2351_v39 = vmax.f32 %v2094_v44, 0.0  ;;  %v2437_v60 = vpack.c.bf16 %v2353_v31, %v2352_v58  ;;  %v2559_v58 = vpop.permute.xlu0 %2558 }
 0x24c   :  { %v4331_v15 = vpop.f32.mrf.mxu1 }
 0x24d   :  { %v2436_v9 = vpack.c.bf16 %v2351_v39, %v2350_v24  ;;  %v2717_v49 = vsel %vm617_vm2, %v2437_v60, %v2545_v26  ;;  %v2356_v10 = vmax.f32 %v4331_v15, 0.0  ;;  %v2561_v24 = vpop.permute.xlu1 %2560 }
 0x24e   :  { %v2107_v20 = vpop.f32.mrf.mxu1 }
 0x24f   :  { %v2714_v59 = vsel %vm617_vm2, %v2436_v9, %v2543_v62  ;;  %v2354_v41 = vmax.f32 %v2107_v20, 0.0 }
 0x250   :  { %v4332_v25 = vpop.f32.mrf.mxu1  ;;  %4463 = vmatprep.mubr.msk.bf16.mxu0 %vm1525_vm3, %v2714_v59 }
 0x251   :  { %v2357_v16 = vmax.f32 %v4332_v25, 0.0  ;;  %4464 = vmatmul.mubr.msk.bf16.gmra.mxu0 %vm1525_vm3, %v2717_v49 }
 0x252   :  { %v2110_v43 = vpop.f32.mrf.mxu1 }
 0x253   :  { %v2355_v18 = vmax.f32 %v2110_v43, 0.0  ;;  %v2439_v13 = vpack.c.bf16 %v2357_v16, %v2356_v10 }
 0x254   :  { %v4335_v48 = vpop.f32.mrf.mxu1 }
 0x255   :  { %v2438_v22 = vpack.c.bf16 %v2355_v18, %v2354_v41  ;;  %v2723_v56 = vsel %vm617_vm2, %v2439_v13, %v2549_v30  ;;  %v2360_v42 = vmax.f32 %v4335_v48, 0.0  ;;  %v2563_v13 = vpop.permute.xlu0 %2562 }
 0x256   :  { %v2123_v0 = vpop.f32.mrf.mxu1 }
 0x257   :  { %v2720_v32 = vsel %vm617_vm2, %v2438_v22, %v2547_v27  ;;  %v2358_v28 = vmax.f32 %v2123_v0, 0.0  ;;  %v2565_v27 = vpop.permute.xlu1 %2564 }
 0x258   :  { %v4336_v33 = vpop.f32.mrf.mxu1  ;;  %4467 = vmatprep.mubr.msk.bf16.mxu0 %vm1525_vm3, %v2720_v32 }
 0x259   :  { %v2361_v40 = vmax.f32 %v4336_v33, 0.0  ;;  %4468 = vmatmul.mubr.msk.bf16.gmra.mxu0 %vm1525_vm3, %v2723_v56 }
 0x25a   :  { %v2126_v29 = vpop.f32.mrf.mxu1 }
 0x25b   :  { %v2359_v52 = vmax.f32 %v2126_v29, 0.0  ;;  %v2441_v50 = vpack.c.bf16 %v2361_v40, %v2360_v42 }
 0x25c   :  { %v4339_v14 = vpop.f32.mrf.mxu1 }
 0x25d   :  { %v2440_v47 = vpack.c.bf16 %v2359_v52, %v2358_v28  ;;  %v2729_v3 = vsel %vm617_vm2, %v2441_v50, %v2553_v35  ;;  %v2364_v45 = vmax.f32 %v4339_v14, 0.0  ;;  %v2567_v35 = vpop.permute.xlu0 %2566 }
 0x25e   :  { %v2139_v19 = vpop.f32.mrf.mxu1 }
 0x25f   :  { %v2726_v57 = vsel %vm617_vm2, %v2440_v47, %v2551_v21  ;;  %v2362_v6 = vmax.f32 %v2139_v19, 0.0 }
 0x260   :  { %v4340_v34 = vpop.f32.mrf.mxu1  ;;  %4471 = vmatprep.mubr.msk.bf16.mxu0 %vm1525_vm3, %v2726_v57  ;;  %v2569_v57 = vpop.permute.xlu1 %2568 }
 0x261   :  { %v2365_v2 = vmax.f32 %v4340_v34, 0.0  ;;  %4472 = vmatmul.mubr.msk.bf16.gmra.mxu0 %vm1525_vm3, %v2729_v3 }
 0x262   :  { %v2142_v23 = vpop.f32.mrf.mxu1 }
 0x263   :  { %v2363_v5 = vmax.f32 %v2142_v23, 0.0  ;;  %v2443_v8 = vpack.c.bf16 %v2365_v2, %v2364_v45 }
 0x264   :  { %v4343_v37 = vpop.f32.mrf.mxu1 }
 0x265   :  { %v2442_v51 = vpack.c.bf16 %v2363_v5, %v2362_v6  ;;  %v2735_v17 = vsel %vm617_vm2, %v2443_v8, %v2557_v63  ;;  %v2368_v12 = vmax.f32 %v4343_v37, 0.0 }
 0x266   :  { %v2155_v4 = vpop.f32.mrf.mxu1 }
 0x267   :  { %v2732_v11 = vsel %vm617_vm2, %v2442_v51, %v2555_v54  ;;  %v2366_v53 = vmax.f32 %v2155_v4, 0.0 }
 0x268   :  { %v4344_v38 = vpop.f32.mrf.mxu1  ;;  %4475 = vmatprep.mubr.msk.bf16.mxu0 %vm1525_vm3, %v2732_v11 }
 0x269   :  { %v2369_v55 = vmax.f32 %v4344_v38, 0.0  ;;  %v4381_v61 = vpop.f32.mrf.mxu0  ;;  %4476 = vmatmul.mubr.msk.bf16.gmra.mxu0 %vm1525_vm3, %v2735_v17  ;;  %v2571_v38 = vpop.permute.xlu0 %2570 }
 0x26a   :  { %3493 = vst.msk [vmem:[%s6203_s4 + $0x10] sm:$0xff] %vm3490_vm4, %v4381_v61  ;;  %v2158_v36 = vpop.f32.mrf.mxu1  ;;  %v2573_v61 = vpop.permute.xlu1 %2572 }
 0x26b   :  { %v2367_v1 = vmax.f32 %v2158_v36, 0.0  ;;  %v2979_v7 = vpop.f32.mrf.mxu0  ;;  %v2445_v46 = vpack.c.bf16 %v2369_v55, %v2368_v12 }
 0x26c   :  { %3491 = vst.msk [vmem:[%s6203_s4] sm:$0xff] %vm3490_vm4, %v2979_v7  ;;  %v4347_v31 = vpop.f32.mrf.mxu1 }
 0x26d   :  { %v2444_v44 = vpack.c.bf16 %v2367_v1, %v2366_v53  ;;  %v4382_v39 = vpop.f32.mrf.mxu0  ;;  %v2741_v9 = vsel %vm617_vm2, %v2445_v46, %v2561_v24  ;;  %v2372_v49 = vmax.f32 %v4347_v31, 0.0 }
 0x26e   :  { %3494 = vst.msk [vmem:[%s6203_s4 + $0x18] sm:$0xff] %vm3490_vm4, %v4382_v39  ;;  %v2171_v60 = vpop.f32.mrf.mxu1 }
 0x26f   :  { %v2738_v15 = vsel %vm617_vm2, %v2444_v44, %v2559_v58  ;;  %v2982_v62 = vpop.f32.mrf.mxu0  ;;  %v2370_v16 = vmax.f32 %v2171_v60, 0.0 }
 0x270   :  { %3492 = vst.msk [vmem:[%s6203_s4 + $0x8] sm:$0xff] %vm3490_vm4, %v2982_v62  ;;  %v4348_v26 = vpop.f32.mrf.mxu1  ;;  %4479 = vmatprep.mubr.msk.bf16.mxu0 %vm1525_vm3, %v2738_v15 }
 0x271   :  { %v2373_v20 = vmax.f32 %v4348_v26, 0.0  ;;  %v4385_v59 = vpop.f32.mrf.mxu0  ;;  %4480 = vmatmul.mubr.msk.bf16.gmra.mxu0 %vm1525_vm3, %v2741_v9  ;;  %v2575_v26 = vpop.permute.xlu0 %2574 }
 0x272   :  { %3497 = vst.msk [vmem:[%s6203_s4 + $0x30] sm:$0xff] %vm3490_vm4, %v4385_v59  ;;  %v2174_v25 = vpop.f32.mrf.mxu1  ;;  %v2577_v59 = vpop.permute.xlu1 %2576 }
 0x273   :  { %v2371_v10 = vmax.f32 %v2174_v25, 0.0  ;;  %v2995_v43 = vpop.f32.mrf.mxu0  ;;  %v2447_v41 = vpack.c.bf16 %v2373_v20, %v2372_v49 }
 0x274   :  { %3495 = vst.msk [vmem:[%s6203_s4 + $0x20] sm:$0xff] %vm3490_vm4, %v2995_v43  ;;  %v4351_v18 = vpop.f32.mrf.mxu1 }
 0x275   :  { %v2446_v48 = vpack.c.bf16 %v2371_v10, %v2370_v16  ;;  %v4386_v22 = vpop.f32.mrf.mxu0  ;;  %v2747_v56 = vsel %vm617_vm2, %v2447_v41, %v2565_v27  ;;  %v2376_v29 = vmax.f32 %v4351_v18, 0.0 }
 0x276   :  { %3498 = vst.msk [vmem:[%s6203_s4 + $0x38] sm:$0xff] %vm3490_vm4, %v4386_v22  ;;  %v2187_v30 = vpop.f32.mrf.mxu1 }
 0x277   :  { %v2744_v0 = vsel %vm617_vm2, %v2446_v48, %v2563_v13  ;;  %v2998_v32 = vpop.f32.mrf.mxu0  ;;  %v2374_v52 = vmax.f32 %v2187_v30, 0.0 }
 0x278   :  { %3496 = vst.msk [vmem:[%s6203_s4 + $0x28] sm:$0xff] %vm3490_vm4, %v2998_v32  ;;  %v4352_v33 = vpop.f32.mrf.mxu1  ;;  %4483 = vmatprep.mubr.msk.bf16.mxu0 %vm1525_vm3, %v2744_v0 }
 0x279   :  { %v2377_v40 = vmax.f32 %v4352_v33, 0.0  ;;  %v4389_v42 = vpop.f32.mrf.mxu0  ;;  %4484 = vmatmul.mubr.msk.bf16.gmra.mxu0 %vm1525_vm3, %v2747_v56  ;;  %v2579_v33 = vpop.permute.xlu0 %2578 }
 0x27a   :  { %3501 = vst.msk [vmem:[%s6203_s4 + $0x50] sm:$0xff] %vm3490_vm4, %v4389_v42  ;;  %v2190_v28 = vpop.f32.mrf.mxu1  ;;  %v2581_v42 = vpop.permute.xlu1 %2580 }
 0x27b   :  { %v2375_v50 = vmax.f32 %v2190_v28, 0.0  ;;  %v3011_v14 = vpop.f32.mrf.mxu0  ;;  %v2449_v21 = vpack.c.bf16 %v2377_v40, %v2376_v29 }
 0x27c   :  { %3499 = vst.msk [vmem:[%s6203_s4 + $0x40] sm:$0xff] %vm3490_vm4, %v3011_v14  ;;  %v4355_v47 = vpop.f32.mrf.mxu1 }
 0x27d   :  { %v2448_v19 = vpack.c.bf16 %v2375_v50, %v2374_v52  ;;  %v4390_v3 = vpop.f32.mrf.mxu0  ;;  %v2753_v23 = vsel %vm617_vm2, %v2449_v21, %v2569_v57  ;;  %v2380_v37 = vmax.f32 %v4355_v47, 0.0 }
 0x27e   :  { %3502 = vst.msk [vmem:[%s6203_s4 + $0x58] sm:$0xff] %vm3490_vm4, %v4390_v3  ;;  %v2203_v34 = vpop.f32.mrf.mxu1 }
 0x27f   :  { %v2750_v2 = vsel %vm617_vm2, %v2448_v19, %v2567_v35  ;;  %v3014_v45 = vpop.f32.mrf.mxu0  ;;  %v2378_v51 = vmax.f32 %v2203_v34, 0.0 }
 0x280   :  { %3500 = vst.msk [vmem:[%s6203_s4 + $0x48] sm:$0xff] %vm3490_vm4, %v3014_v45  ;;  %v4356_v6 = vpop.f32.mrf.mxu1  ;;  %4487 = vmatprep.mubr.msk.bf16.mxu0 %vm1525_vm3, %v2750_v2 }
 0x281   :  { %v2381_v5 = vmax.f32 %v4356_v6, 0.0  ;;  %v4393_v8 = vpop.f32.mrf.mxu0  ;;  %4488 = vmatmul.mubr.msk.bf16.gmra.mxu0 %vm1525_vm3, %v2753_v23  ;;  %v2583_v23 = vpop.permute.xlu0 %2582 }
 0x282   :  { %3505 = vst.msk [vmem:[%s6203_s4 + $0x70] sm:$0xff] %vm3490_vm4, %v4393_v8  ;;  %v2206_v54 = vpop.f32.mrf.mxu1 }
 0x283   :  { %v2379_v63 = vmax.f32 %v2206_v54, 0.0  ;;  %v3027_v4 = vpop.f32.mrf.mxu0  ;;  %v2451_v11 = vpack.c.bf16 %v2381_v5, %v2380_v37  ;;  %v2585_v5 = vpop.permute.xlu1 %2584 }
 0x284   :  { %3503 = vst.msk [vmem:[%s6203_s4 + $0x60] sm:$0xff] %vm3490_vm4, %v3027_v4  ;;  %v4359_v17 = vpop.f32.mrf.mxu1 }
 0x285   :  { %v2450_v55 = vpack.c.bf16 %v2379_v63, %v2378_v51  ;;  %v4394_v12 = vpop.f32.mrf.mxu0  ;;  %v2759_v7 = vsel %vm617_vm2, %v2451_v11, %v2573_v61  ;;  %v2384_v44 = vmax.f32 %v4359_v17, 0.0 }
 0x286   :  { %3506 = vst.msk [vmem:[%s6203_s4 + $0x78] sm:$0xff] %vm3490_vm4, %v4394_v12  ;;  %v2219_v36 = vpop.f32.mrf.mxu1 }
 0x287   :  { %v2756_v53 = vsel %vm617_vm2, %v2450_v55, %v2571_v38  ;;  %v3030_v1 = vpop.f32.mrf.mxu0  ;;  %v2382_v39 = vmax.f32 %v2219_v36, 0.0 }
 0x288   :  { %3504 = vst.msk [vmem:[%s6203_s4 + $0x68] sm:$0xff] %vm3490_vm4, %v3030_v1  ;;  %v4360_v46 = vpop.f32.mrf.mxu1  ;;  %4491 = vmatprep.mubr.msk.bf16.mxu0 %vm1525_vm3, %v2756_v53 }
 0x289   :  { %v2385_v31 = vmax.f32 %v4360_v46, 0.0  ;;  %v4397_v58 = vpop.f32.mrf.mxu0  ;;  %4492 = vmatmul.mubr.msk.bf16.gmra.mxu0 %vm1525_vm3, %v2759_v7 }
 0x28a   :  { %3509 = vst.msk [vmem:[%s6203_s4 + $0x90] sm:$0xff] %vm3490_vm4, %v4397_v58  ;;  %v2222_v24 = vpop.f32.mrf.mxu1 }
 0x28b   :  { %v2383_v60 = vmax.f32 %v2222_v24, 0.0  ;;  %v3043_v15 = vpop.f32.mrf.mxu0  ;;  %v2453_v62 = vpack.c.bf16 %v2385_v31, %v2384_v44 }
 0x28c   :  { %3507 = vst.msk [vmem:[%s6203_s4 + $0x80] sm:$0xff] %vm3490_vm4, %v3043_v15  ;;  %v4363_v9 = vpop.f32.mrf.mxu1 }
 0x28d   :  { %v2452_v20 = vpack.c.bf16 %v2383_v60, %v2382_v39  ;;  %v4398_v49 = vpop.f32.mrf.mxu0  ;;  %v2765_v43 = vsel %vm617_vm2, %v2453_v62, %v2577_v59  ;;  %v2388_v48 = vmax.f32 %v4363_v9, 0.0 }
 0x28e   :  { %3510 = vst.msk [vmem:[%s6203_s4 + $0x98] sm:$0xff] %vm3490_vm4, %v4398_v49  ;;  %v2235_v25 = vpop.f32.mrf.mxu1 }
 0x28f   :  { %v2762_v16 = vsel %vm617_vm2, %v2452_v20, %v2575_v26  ;;  %v3046_v10 = vpop.f32.mrf.mxu0  ;;  %v2386_v22 = vmax.f32 %v2235_v25, 0.0 }
 0x290   :  { %3508 = vst.msk [vmem:[%s6203_s4 + $0x88] sm:$0xff] %vm3490_vm4, %v3046_v10  ;;  %v4364_v41 = vpop.f32.mrf.mxu1  ;;  %4495 = vmatprep.mubr.msk.bf16.mxu0 %vm1525_vm3, %v2762_v16 }
 0x291   :  { %v2389_v18 = vmax.f32 %v4364_v41, 0.0  ;;  %v4401_v13 = vpop.f32.mrf.mxu0  ;;  %4496 = vmatmul.mubr.msk.bf16.gmra.mxu0 %vm1525_vm3, %v2765_v43 }
 0x292   :  { %3513 = vst.msk [vmem:[%s6203_s4 + $0xb0] sm:$0xff] %vm3490_vm4, %v4401_v13  ;;  %v2238_v27 = vpop.f32.mrf.mxu1 }
 0x293   :  { %v2387_v30 = vmax.f32 %v2238_v27, 0.0  ;;  %v3059_v0 = vpop.f32.mrf.mxu0  ;;  %v2455_v32 = vpack.c.bf16 %v2389_v18, %v2388_v48 }
 0x294   :  { %3511 = vst.msk [vmem:[%s6203_s4 + $0xa0] sm:$0xff] %vm3490_vm4, %v3059_v0  ;;  %v4367_v56 = vpop.f32.mrf.mxu1 }
 0x295   :  { %v2454_v40 = vpack.c.bf16 %v2387_v30, %v2386_v22  ;;  %v4402_v29 = vpop.f32.mrf.mxu0  ;;  %v2771_v14 = vsel %vm617_vm2, %v2455_v32, %v2581_v42  ;;  %v2392_v19 = vmax.f32 %v4367_v56, 0.0 }
 0x296   :  { %3514 = vst.msk [vmem:[%s6203_s4 + $0xb8] sm:$0xff] %vm3490_vm4, %v4402_v29  ;;  %v2251_v28 = vpop.f32.mrf.mxu1 }
 0x297   :  { %v2768_v52 = vsel %vm617_vm2, %v2454_v40, %v2579_v33  ;;  %v3062_v50 = vpop.f32.mrf.mxu0  ;;  %v2390_v3 = vmax.f32 %v2251_v28, 0.0 }
 0x298   :  { %3512 = vst.msk [vmem:[%s6203_s4 + $0xa8] sm:$0xff] %vm3490_vm4, %v3062_v50  ;;  %v4368_v21 = vpop.f32.mrf.mxu1  ;;  %4499 = vmatprep.mubr.msk.bf16.mxu0 %vm1525_vm3, %v2768_v52 }
 0x299   :  { %v2393_v47 = vmax.f32 %v4368_v21, 0.0  ;;  %v4405_v35 = vpop.f32.mrf.mxu0  ;;  %4500 = vmatmul.mubr.msk.bf16.gmra.mxu0 %vm1525_vm3, %v2771_v14 }
 0x29a   :  { %3517 = vst.msk [vmem:[%s6203_s4 + $0xd0] sm:$0xff] %vm3490_vm4, %v4405_v35  ;;  %v2254_v57 = vpop.f32.mrf.mxu1 }
 0x29b   :  { %v2391_v34 = vmax.f32 %v2254_v57, 0.0  ;;  %v3075_v2 = vpop.f32.mrf.mxu0  ;;  %v2457_v45 = vpack.c.bf16 %v2393_v47, %v2392_v19 }
 0x29c   :  { %3515 = vst.msk [vmem:[%s6203_s4 + $0xc0] sm:$0xff] %vm3490_vm4, %v3075_v2 }
 0x29d   :  { %v2456_v6 = vpack.c.bf16 %v2391_v34, %v2390_v3  ;;  %v4406_v8 = vpop.f32.mrf.mxu0  ;;  %v2777_v51 = vsel %vm617_vm2, %v2457_v45, %v2585_v5 }
 0x29e   :  { %3518 = vst.msk [vmem:[%s6203_s4 + $0xd8] sm:$0xff] %vm3490_vm4, %v4406_v8 }
 0x29f   :  { %v2774_v37 = vsel %vm617_vm2, %v2456_v6, %v2583_v23  ;;  %v3078_v54 = vpop.f32.mrf.mxu0 }
 0x2a0   :  { %3516 = vst.msk [vmem:[%s6203_s4 + $0xc8] sm:$0xff] %vm3490_vm4, %v3078_v54  ;;  %4503 = vmatprep.mubr.msk.bf16.mxu0 %vm1525_vm3, %v2774_v37 }
 0x2a1   :  { %v4409_v63 = vpop.f32.mrf.mxu0  ;;  %4504 = vmatmul.mubr.msk.bf16.gmra.mxu0 %vm1525_vm3, %v2777_v51 }
 0x2a2   :  { %3521 = vst.msk [vmem:[%s6203_s4 + $0xf0] sm:$0xff] %vm3490_vm4, %v4409_v63 }
 0x2a3   :  { %v3091_v4 = vpop.f32.mrf.mxu0 }
 0x2a4   :  { %3519 = vst.msk [vmem:[%s6203_s4 + $0xe0] sm:$0xff] %vm3490_vm4, %v3091_v4 }
 0x2a5   :  { %v4410_v11 = vpop.f32.mrf.mxu0 }
 0x2a6   :  { %3522 = vst.msk [vmem:[%s6203_s4 + $0xf8] sm:$0xff] %vm3490_vm4, %v4410_v11 }
 0x2a7   :  { %v3094_v17 = vpop.f32.mrf.mxu0 }
 0x2a8   :  { %3520 = vst.msk [vmem:[%s6203_s4 + $0xe8] sm:$0xff] %vm3490_vm4, %v3094_v17 }
 0x2a9   :  { %v4413_v38 = vpop.f32.mrf.mxu0 }
 0x2aa   :  { %3525 = vst.msk [vmem:[%s6203_s4 + $0x110] sm:$0xff] %vm3490_vm4, %v4413_v38 }
 0x2ab   :  { %v3107_v55 = vpop.f32.mrf.mxu0 }
 0x2ac   :  { %3523 = vst.msk [vmem:[%s6203_s4 + $0x100] sm:$0xff] %vm3490_vm4, %v3107_v55 }
 0x2ad   :  { %v4414_v61 = vpop.f32.mrf.mxu0 }
 0x2ae   :  { %3526 = vst.msk [vmem:[%s6203_s4 + $0x118] sm:$0xff] %vm3490_vm4, %v4414_v61 }
 0x2af   :  { %v3110_v12 = vpop.f32.mrf.mxu0 }
 0x2b0   :  { %3524 = vst.msk [vmem:[%s6203_s4 + $0x108] sm:$0xff] %vm3490_vm4, %v3110_v12 }
 0x2b1   :  { %v4417_v36 = vpop.f32.mrf.mxu0 }
 0x2b2   :  { %3529 = vst.msk [vmem:[%s6203_s4 + $0x130] sm:$0xff] %vm3490_vm4, %v4417_v36 }
 0x2b3   :  { %v3123_v53 = vpop.f32.mrf.mxu0 }
 0x2b4   :  { %3527 = vst.msk [vmem:[%s6203_s4 + $0x120] sm:$0xff] %vm3490_vm4, %v3123_v53 }
 0x2b5   :  { %v4418_v1 = vpop.f32.mrf.mxu0 }
 0x2b6   :  { %3530 = vst.msk [vmem:[%s6203_s4 + $0x138] sm:$0xff] %vm3490_vm4, %v4418_v1 }
 0x2b7   :  { %v3126_v7 = vpop.f32.mrf.mxu0 }
 0x2b8   :  { %3528 = vst.msk [vmem:[%s6203_s4 + $0x128] sm:$0xff] %vm3490_vm4, %v3126_v7 }
 0x2b9   :  { %v4421_v46 = vpop.f32.mrf.mxu0 }
 0x2ba   :  { %3533 = vst.msk [vmem:[%s6203_s4 + $0x150] sm:$0xff] %vm3490_vm4, %v4421_v46 }
 0x2bb   :  { %v3139_v31 = vpop.f32.mrf.mxu0 }
 0x2bc   :  { %3531 = vst.msk [vmem:[%s6203_s4 + $0x140] sm:$0xff] %vm3490_vm4, %v3139_v31 }
 0x2bd   :  { %v4422_v58 = vpop.f32.mrf.mxu0 }
 0x2be   :  { %3534 = vst.msk [vmem:[%s6203_s4 + $0x158] sm:$0xff] %vm3490_vm4, %v4422_v58 }
 0x2bf   :  { %v3142_v44 = vpop.f32.mrf.mxu0 }
 0x2c0   :  { %3532 = vst.msk [vmem:[%s6203_s4 + $0x148] sm:$0xff] %vm3490_vm4, %v3142_v44 }
 0x2c1   :  { %v4425_v24 = vpop.f32.mrf.mxu0 }
 0x2c2   :  { %3537 = vst.msk [vmem:[%s6203_s4 + $0x170] sm:$0xff] %vm3490_vm4, %v4425_v24 }
 0x2c3   :  { %v3155_v39 = vpop.f32.mrf.mxu0 }
 0x2c4   :  { %3535 = vst.msk [vmem:[%s6203_s4 + $0x160] sm:$0xff] %vm3490_vm4, %v3155_v39 }
 0x2c5   :  { %v4426_v60 = vpop.f32.mrf.mxu0 }
 0x2c6   :  { %3538 = vst.msk [vmem:[%s6203_s4 + $0x178] sm:$0xff] %vm3490_vm4, %v4426_v60 }
 0x2c7   :  { %v3158_v15 = vpop.f32.mrf.mxu0 }
 0x2c8   :  { %3536 = vst.msk [vmem:[%s6203_s4 + $0x168] sm:$0xff] %vm3490_vm4, %v3158_v15 }
 0x2c9   :  { %v4429_v62 = vpop.f32.mrf.mxu0 }
 0x2ca   :  { %3541 = vst.msk [vmem:[%s6203_s4 + $0x190] sm:$0xff] %vm3490_vm4, %v4429_v62 }
 0x2cb   :  { %v3171_v9 = vpop.f32.mrf.mxu0 }
 0x2cc   :  { %3539 = vst.msk [vmem:[%s6203_s4 + $0x180] sm:$0xff] %vm3490_vm4, %v3171_v9 }
 0x2cd   :  { %v4430_v26 = vpop.f32.mrf.mxu0 }
 0x2ce   :  { %3542 = vst.msk [vmem:[%s6203_s4 + $0x198] sm:$0xff] %vm3490_vm4, %v4430_v26 }
 0x2cf   :  { %v3174_v20 = vpop.f32.mrf.mxu0 }
 0x2d0   :  { %3540 = vst.msk [vmem:[%s6203_s4 + $0x188] sm:$0xff] %vm3490_vm4, %v3174_v20 }
 0x2d1   :  { %v4433_v59 = vpop.f32.mrf.mxu0 }
 0x2d2   :  { %3545 = vst.msk [vmem:[%s6203_s4 + $0x1b0] sm:$0xff] %vm3490_vm4, %v4433_v59 }
 0x2d3   :  { %v3187_v49 = vpop.f32.mrf.mxu0 }
 0x2d4   :  { %3543 = vst.msk [vmem:[%s6203_s4 + $0x1a0] sm:$0xff] %vm3490_vm4, %v3187_v49 }
 0x2d5   :  { %v4434_v25 = vpop.f32.mrf.mxu0 }
 0x2d6   :  { %3546 = vst.msk [vmem:[%s6203_s4 + $0x1b8] sm:$0xff] %vm3490_vm4, %v4434_v25 }
 0x2d7   :  { %v3190_v16 = vpop.f32.mrf.mxu0 }
 0x2d8   :  { %3544 = vst.msk [vmem:[%s6203_s4 + $0x1a8] sm:$0xff] %vm3490_vm4, %v3190_v16 }
 0x2d9   :  { %v4437_v10 = vpop.f32.mrf.mxu0 }
 0x2da   :  { %3549 = vst.msk [vmem:[%s6203_s4 + $0x1d0] sm:$0xff] %vm3490_vm4, %v4437_v10 }
 0x2db   :  { %v3203_v43 = vpop.f32.mrf.mxu0 }
 0x2dc   :  { %3547 = vst.msk [vmem:[%s6203_s4 + $0x1c0] sm:$0xff] %vm3490_vm4, %v3203_v43 }
 0x2dd   :  { %v4438_v41 = vpop.f32.mrf.mxu0 }
 0x2de   :  { %3550 = vst.msk [vmem:[%s6203_s4 + $0x1d8] sm:$0xff] %vm3490_vm4, %v4438_v41 }
 0x2df   :  { %v3206_v18 = vpop.f32.mrf.mxu0 }
 0x2e0   :  { %3548 = vst.msk [vmem:[%s6203_s4 + $0x1c8] sm:$0xff] %vm3490_vm4, %v3206_v18 }
 0x2e1   :  { %v4441_v13 = vpop.f32.mrf.mxu0 }
 0x2e2   :  { %3553 = vst.msk [vmem:[%s6203_s4 + $0x1f0] sm:$0xff] %vm3490_vm4, %v4441_v13 }
 0x2e3   :  { %v3219_v48 = vpop.f32.mrf.mxu0 }
 0x2e4   :  { %3551 = vst.msk [vmem:[%s6203_s4 + $0x1e0] sm:$0xff] %vm3490_vm4, %v3219_v48 }
 0x2e5   :  { %v4442_v27 = vpop.f32.mrf.mxu0 }
 0x2e6   :  { %3554 = vst.msk [vmem:[%s6203_s4 + $0x1f8] sm:$0xff] %vm3490_vm4, %v4442_v27 }
 0x2e7   :  { %v3222_v22 = vpop.f32.mrf.mxu0 }
 0x2e8   :  { %3552 = vst.msk [vmem:[%s6203_s4 + $0x1e8] sm:$0xff] %vm3490_vm4, %v3222_v22 }
 0x2e9   :  { %v4445_v30 = vpop.f32.mrf.mxu0 }
 0x2ea   :  { %3557 = vst.msk [vmem:[%s6203_s4 + $0x210] sm:$0xff] %vm3490_vm4, %v4445_v30 }
 0x2eb   :  { %v3235_v0 = vpop.f32.mrf.mxu0 }
 0x2ec   :  { %3555 = vst.msk [vmem:[%s6203_s4 + $0x200] sm:$0xff] %vm3490_vm4, %v3235_v0 }
 0x2ed   :  { %v4446_v32 = vpop.f32.mrf.mxu0 }
 0x2ee   :  { %3558 = vst.msk [vmem:[%s6203_s4 + $0x218] sm:$0xff] %vm3490_vm4, %v4446_v32 }
 0x2ef   :  { %v3238_v56 = vpop.f32.mrf.mxu0 }
 0x2f0   :  { %3556 = vst.msk [vmem:[%s6203_s4 + $0x208] sm:$0xff] %vm3490_vm4, %v3238_v56 }
 0x2f1   :  { %v4449_v33 = vpop.f32.mrf.mxu0 }
 0x2f2   :  { %3561 = vst.msk [vmem:[%s6203_s4 + $0x230] sm:$0xff] %vm3490_vm4, %v4449_v33 }
 0x2f3   :  { %v3251_v40 = vpop.f32.mrf.mxu0 }
 0x2f4   :  { %3559 = vst.msk [vmem:[%s6203_s4 + $0x220] sm:$0xff] %vm3490_vm4, %v3251_v40 }
 0x2f5   :  { %v4450_v42 = vpop.f32.mrf.mxu0 }
 0x2f6   :  { %3562 = vst.msk [vmem:[%s6203_s4 + $0x238] sm:$0xff] %vm3490_vm4, %v4450_v42 }
 0x2f7   :  { %v3254_v29 = vpop.f32.mrf.mxu0 }
 0x2f8   :  { %3560 = vst.msk [vmem:[%s6203_s4 + $0x228] sm:$0xff] %vm3490_vm4, %v3254_v29 }
 0x2f9   :  { %v4453_v28 = vpop.f32.mrf.mxu0 }
 0x2fa   :  { %3565 = vst.msk [vmem:[%s6203_s4 + $0x250] sm:$0xff] %vm3490_vm4, %v4453_v28 }
 0x2fb   :  { %v3267_v52 = vpop.f32.mrf.mxu0 }
 0x2fc   :  { %3563 = vst.msk [vmem:[%s6203_s4 + $0x240] sm:$0xff] %vm3490_vm4, %v3267_v52 }
 0x2fd   :  { %v4454_v50 = vpop.f32.mrf.mxu0 }
 0x2fe   :  { %3566 = vst.msk [vmem:[%s6203_s4 + $0x258] sm:$0xff] %vm3490_vm4, %v4454_v50 }
 0x2ff   :  { %v3270_v14 = vpop.f32.mrf.mxu0 }
 0x300   :  { %3564 = vst.msk [vmem:[%s6203_s4 + $0x248] sm:$0xff] %vm3490_vm4, %v3270_v14 }
 0x301   :  { %v4457_v21 = vpop.f32.mrf.mxu0 }
 0x302   :  { %3569 = vst.msk [vmem:[%s6203_s4 + $0x270] sm:$0xff] %vm3490_vm4, %v4457_v21 }
 0x303   :  { %v3283_v47 = vpop.f32.mrf.mxu0 }
 0x304   :  { %3567 = vst.msk [vmem:[%s6203_s4 + $0x260] sm:$0xff] %vm3490_vm4, %v3283_v47 }
 0x305   :  { %v4458_v35 = vpop.f32.mrf.mxu0 }
 0x306   :  { %3570 = vst.msk [vmem:[%s6203_s4 + $0x278] sm:$0xff] %vm3490_vm4, %v4458_v35 }
 0x307   :  { %v3286_v19 = vpop.f32.mrf.mxu0 }
 0x308   :  { %3568 = vst.msk [vmem:[%s6203_s4 + $0x268] sm:$0xff] %vm3490_vm4, %v3286_v19 }
 0x309   :  { %v4461_v57 = vpop.f32.mrf.mxu0 }
 0x30a   :  { %3573 = vst.msk [vmem:[%s6203_s4 + $0x290] sm:$0xff] %vm3490_vm4, %v4461_v57 }
 0x30b   :  { %v3299_v3 = vpop.f32.mrf.mxu0 }
 0x30c   :  { %3571 = vst.msk [vmem:[%s6203_s4 + $0x280] sm:$0xff] %vm3490_vm4, %v3299_v3 }
 0x30d   :  { %v4462_v34 = vpop.f32.mrf.mxu0 }
 0x30e   :  { %3574 = vst.msk [vmem:[%s6203_s4 + $0x298] sm:$0xff] %vm3490_vm4, %v4462_v34 }
 0x30f   :  { %v3302_v2 = vpop.f32.mrf.mxu0 }
 0x310   :  { %3572 = vst.msk [vmem:[%s6203_s4 + $0x288] sm:$0xff] %vm3490_vm4, %v3302_v2 }
 0x311   :  { %v4465_v45 = vpop.f32.mrf.mxu0 }
 0x312   :  { %3577 = vst.msk [vmem:[%s6203_s4 + $0x2b0] sm:$0xff] %vm3490_vm4, %v4465_v45 }
 0x313   :  { %v3315_v23 = vpop.f32.mrf.mxu0 }
 0x314   :  { %3575 = vst.msk [vmem:[%s6203_s4 + $0x2a0] sm:$0xff] %vm3490_vm4, %v3315_v23 }
 0x315   :  { %v4466_v6 = vpop.f32.mrf.mxu0 }
 0x316   :  { %3578 = vst.msk [vmem:[%s6203_s4 + $0x2b8] sm:$0xff] %vm3490_vm4, %v4466_v6 }
 0x317   :  { %v3318_v5 = vpop.f32.mrf.mxu0 }
 0x318   :  { %3576 = vst.msk [vmem:[%s6203_s4 + $0x2a8] sm:$0xff] %vm3490_vm4, %v3318_v5 }
 0x319   :  { %v4469_v8 = vpop.f32.mrf.mxu0 }
 0x31a   :  { %3581 = vst.msk [vmem:[%s6203_s4 + $0x2d0] sm:$0xff] %vm3490_vm4, %v4469_v8 }
 0x31b   :  { %v3331_v37 = vpop.f32.mrf.mxu0 }
 0x31c   :  { %3579 = vst.msk [vmem:[%s6203_s4 + $0x2c0] sm:$0xff] %vm3490_vm4, %v3331_v37 }
 0x31d   :  { %v4470_v54 = vpop.f32.mrf.mxu0 }
 0x31e   :  { %3582 = vst.msk [vmem:[%s6203_s4 + $0x2d8] sm:$0xff] %vm3490_vm4, %v4470_v54 }
 0x31f   :  { %v3334_v51 = vpop.f32.mrf.mxu0 }
 0x320   :  { %3580 = vst.msk [vmem:[%s6203_s4 + $0x2c8] sm:$0xff] %vm3490_vm4, %v3334_v51 }
 0x321   :  { %v4473_v63 = vpop.f32.mrf.mxu0 }
 0x322   :  { %3585 = vst.msk [vmem:[%s6203_s4 + $0x2f0] sm:$0xff] %vm3490_vm4, %v4473_v63 }
 0x323   :  { %v3347_v4 = vpop.f32.mrf.mxu0 }
 0x324   :  { %3583 = vst.msk [vmem:[%s6203_s4 + $0x2e0] sm:$0xff] %vm3490_vm4, %v3347_v4 }
 0x325   :  { %v4474_v11 = vpop.f32.mrf.mxu0 }
 0x326   :  { %3586 = vst.msk [vmem:[%s6203_s4 + $0x2f8] sm:$0xff] %vm3490_vm4, %v4474_v11 }
 0x327   :  { %v3350_v17 = vpop.f32.mrf.mxu0 }
 0x328   :  { %3584 = vst.msk [vmem:[%s6203_s4 + $0x2e8] sm:$0xff] %vm3490_vm4, %v3350_v17 }
 0x329   :  { %v4477_v38 = vpop.f32.mrf.mxu0 }
 0x32a   :  { %3589 = vst.msk [vmem:[%s6203_s4 + $0x310] sm:$0xff] %vm3490_vm4, %v4477_v38 }
 0x32b   :  { %v3363_v55 = vpop.f32.mrf.mxu0 }
 0x32c   :  { %3587 = vst.msk [vmem:[%s6203_s4 + $0x300] sm:$0xff] %vm3490_vm4, %v3363_v55 }
 0x32d   :  { %v4478_v61 = vpop.f32.mrf.mxu0 }
 0x32e   :  { %3590 = vst.msk [vmem:[%s6203_s4 + $0x318] sm:$0xff] %vm3490_vm4, %v4478_v61 }
 0x32f   :  { %v3366_v12 = vpop.f32.mrf.mxu0 }
 0x330   :  { %3588 = vst.msk [vmem:[%s6203_s4 + $0x308] sm:$0xff] %vm3490_vm4, %v3366_v12 }
 0x331   :  { %v4481_v36 = vpop.f32.mrf.mxu0 }
 0x332   :  { %3593 = vst.msk [vmem:[%s6203_s4 + $0x330] sm:$0xff] %vm3490_vm4, %v4481_v36 }
 0x333   :  { %v3379_v53 = vpop.f32.mrf.mxu0 }
 0x334   :  { %3591 = vst.msk [vmem:[%s6203_s4 + $0x320] sm:$0xff] %vm3490_vm4, %v3379_v53 }
 0x335   :  { %v4482_v1 = vpop.f32.mrf.mxu0 }
 0x336   :  { %3594 = vst.msk [vmem:[%s6203_s4 + $0x338] sm:$0xff] %vm3490_vm4, %v4482_v1 }
 0x337   :  { %v3382_v7 = vpop.f32.mrf.mxu0 }
 0x338   :  { %3592 = vst.msk [vmem:[%s6203_s4 + $0x328] sm:$0xff] %vm3490_vm4, %v3382_v7 }
 0x339   :  { %v4485_v46 = vpop.f32.mrf.mxu0 }
 0x33a   :  { %3597 = vst.msk [vmem:[%s6203_s4 + $0x350] sm:$0xff] %vm3490_vm4, %v4485_v46 }
 0x33b   :  { %v3395_v31 = vpop.f32.mrf.mxu0 }
 0x33c   :  { %3595 = vst.msk [vmem:[%s6203_s4 + $0x340] sm:$0xff] %vm3490_vm4, %v3395_v31 }
 0x33d   :  { %v4486_v58 = vpop.f32.mrf.mxu0 }
 0x33e   :  { %3598 = vst.msk [vmem:[%s6203_s4 + $0x358] sm:$0xff] %vm3490_vm4, %v4486_v58 }
 0x33f   :  { %v3398_v44 = vpop.f32.mrf.mxu0 }
 0x340   :  { %3596 = vst.msk [vmem:[%s6203_s4 + $0x348] sm:$0xff] %vm3490_vm4, %v3398_v44 }
 0x341   :  { %v4489_v24 = vpop.f32.mrf.mxu0 }
 0x342   :  { %3601 = vst.msk [vmem:[%s6203_s4 + $0x370] sm:$0xff] %vm3490_vm4, %v4489_v24 }
 0x343   :  { %v3411_v39 = vpop.f32.mrf.mxu0 }
 0x344   :  { %3599 = vst.msk [vmem:[%s6203_s4 + $0x360] sm:$0xff] %vm3490_vm4, %v3411_v39 }
 0x345   :  { %v4490_v60 = vpop.f32.mrf.mxu0 }
 0x346   :  { %3602 = vst.msk [vmem:[%s6203_s4 + $0x378] sm:$0xff] %vm3490_vm4, %v4490_v60 }
 0x347   :  { %v3414_v15 = vpop.f32.mrf.mxu0 }
 0x348   :  { %3600 = vst.msk [vmem:[%s6203_s4 + $0x368] sm:$0xff] %vm3490_vm4, %v3414_v15 }
 0x349   :  { %v4493_v62 = vpop.f32.mrf.mxu0 }
 0x34a   :  { %3605 = vst.msk [vmem:[%s6203_s4 + $0x390] sm:$0xff] %vm3490_vm4, %v4493_v62 }
 0x34b   :  { %v3427_v9 = vpop.f32.mrf.mxu0 }
 0x34c   :  { %3603 = vst.msk [vmem:[%s6203_s4 + $0x380] sm:$0xff] %vm3490_vm4, %v3427_v9 }
 0x34d   :  { %v4494_v26 = vpop.f32.mrf.mxu0 }
 0x34e   :  { %3606 = vst.msk [vmem:[%s6203_s4 + $0x398] sm:$0xff] %vm3490_vm4, %v4494_v26 }
 0x34f   :  { %v3430_v20 = vpop.f32.mrf.mxu0 }
 0x350   :  { %3604 = vst.msk [vmem:[%s6203_s4 + $0x388] sm:$0xff] %vm3490_vm4, %v3430_v20 }
 0x351   :  { %v4497_v59 = vpop.f32.mrf.mxu0 }
 0x352   :  { %3609 = vst.msk [vmem:[%s6203_s4 + $0x3b0] sm:$0xff] %vm3490_vm4, %v4497_v59 }
 0x353   :  { %v3443_v49 = vpop.f32.mrf.mxu0 }
 0x354   :  { %3607 = vst.msk [vmem:[%s6203_s4 + $0x3a0] sm:$0xff] %vm3490_vm4, %v3443_v49 }
 0x355   :  { %v4498_v25 = vpop.f32.mrf.mxu0 }
 0x356   :  { %3610 = vst.msk [vmem:[%s6203_s4 + $0x3b8] sm:$0xff] %vm3490_vm4, %v4498_v25 }
 0x357   :  { %v3446_v16 = vpop.f32.mrf.mxu0 }
 0x358   :  { %3608 = vst.msk [vmem:[%s6203_s4 + $0x3a8] sm:$0xff] %vm3490_vm4, %v3446_v16 }
 0x359   :  { %v4501_v10 = vpop.f32.mrf.mxu0 }
 0x35a   :  { %3613 = vst.msk [vmem:[%s6203_s4 + $0x3d0] sm:$0xff] %vm3490_vm4, %v4501_v10 }
 0x35b   :  { %v3459_v43 = vpop.f32.mrf.mxu0 }
 0x35c   :  { %3611 = vst.msk [vmem:[%s6203_s4 + $0x3c0] sm:$0xff] %vm3490_vm4, %v3459_v43 }
 0x35d   :  { %v4502_v41 = vpop.f32.mrf.mxu0 }
 0x35e   :  { %3614 = vst.msk [vmem:[%s6203_s4 + $0x3d8] sm:$0xff] %vm3490_vm4, %v4502_v41 }
 0x35f   :  { %v3462_v18 = vpop.f32.mrf.mxu0 }
 0x360   :  { %3612 = vst.msk [vmem:[%s6203_s4 + $0x3c8] sm:$0xff] %vm3490_vm4, %v3462_v18 }
 0x361   :  { %v4505_v13 = vpop.f32.mrf.mxu0 }
 0x362   :  { %3617 = vst.msk [vmem:[%s6203_s4 + $0x3f0] sm:$0xff] %vm3490_vm4, %v4505_v13 }
 0x363   :  { %v3475_v48 = vpop.f32.mrf.mxu0 }
 0x364   :  { %3615 = vst.msk [vmem:[%s6203_s4 + $0x3e0] sm:$0xff] %vm3490_vm4, %v3475_v48 }
 0x365   :  { %v4506_v27 = vpop.f32.mrf.mxu0 }
 0x366   :  { %3618 = vst.msk [vmem:[%s6203_s4 + $0x3f8] sm:$0xff] %vm3490_vm4, %v4506_v27 }
 0x367   :  { %v3478_v22 = vpop.f32.mrf.mxu0 }
 0x368   :  { %3616 = vst.msk [vmem:[%s6203_s4 + $0x3e8] sm:$0xff] %vm3490_vm4, %v3478_v22 }

</bundles_post_ra>
